<compile_context>
chip_gen: v5e
topology: v5e:2x2
jax: 0.10.0
libtpu: 0.0.40
codegen_flags: <defaults>
</compile_context>

<pallas_src>
import functools

import numpy as np
import jax
import jax.numpy as jnp
from jax.experimental import pallas as pl
from jax.experimental.pallas import tpu as pltpu


_VMEM_LIMIT_BYTES = 48 * 1024 * 1024  # safe on v5e/v6e (128 MiB) and v7x (64 MiB)
_LRELU_ALPHA = 0.2
_IN_EPS = 1e-5


def _round_up(x, m):
    return (x + m - 1) // m * m


# ---------------------------------------------------------------------------
# Pallas kernels
# ---------------------------------------------------------------------------

def _mm_epilogue_kernel(*refs, alpha, use_bias, use_act):
    """One (TM, K) x (K, Cout) MXU matmul tile; optional bias + LeakyReLU in f32."""
    if use_bias:
        x_ref, w_ref, b_ref, o_ref = refs
    else:
        x_ref, w_ref, o_ref = refs
    y = jnp.dot(x_ref[...], w_ref[...], preferred_element_type=jnp.float32)
    if use_bias:
        y = y + b_ref[...].astype(jnp.float32)
    if use_act:
        y = jnp.where(y >= 0.0, y, alpha * y)
    o_ref[...] = y.astype(o_ref.dtype)


def _mm_inorm_lrelu_kernel(x_ref, w_ref, o_ref, *, eps, alpha):
    """Per-sample conv-as-matmul with InstanceNorm + LeakyReLU fused in the epilogue.

    x_ref block: (1, HW, K) bf16 — the whole spatial extent of one sample, so the
    per-channel mean/var over HW are exact (biased variance, no affine).
    """
    x = x_ref[0]                                   # (HW, K)   bf16
    w = w_ref[...]                                 # (K, Cout) bf16
    y = jnp.dot(x, w, preferred_element_type=jnp.float32)   # (HW, Cout) f32
    mean = jnp.mean(y, axis=0, keepdims=True)                # (1, Cout)
    var = jnp.mean(jnp.square(y - mean), axis=0, keepdims=True)
    y = (y - mean) * jax.lax.rsqrt(var + eps)
    y = jnp.where(y >= 0.0, y, alpha * y)
    o_ref[0] = y.astype(o_ref.dtype)


# ---------------------------------------------------------------------------
# pallas_call wrappers
# ---------------------------------------------------------------------------

def conv_matmul_tiled(patches, w_mat, bias, *, alpha, use_act, out_dtype, tm=512):
    """Y = patches @ w_mat (+ bias) (-> LeakyReLU), tiled over M rows."""
    M, K = patches.shape
    Cout = w_mat.shape[1]
    TM = min(tm, _round_up(M, 8))
    M_pad = _round_up(M, TM)
    if M_pad != M:
        patches = jnp.pad(patches, ((0, M_pad - M), (0, 0)))

    use_bias = bias is not None
    kern = functools.partial(_mm_epilogue_kernel, alpha=alpha,
                             use_bias=use_bias, use_act=use_act)

    in_specs = [
        pl.BlockSpec((TM, K), lambda i: (i, 0)),        # M-tiled patches
        pl.BlockSpec((K, Cout), lambda i: (0, 0)),      # VMEM-resident weights
    ]
    args = [patches, w_mat]
    if use_bias:
        in_specs.append(pl.BlockSpec((1, Cout), lambda i: (0, 0)))
        args.append(bias.reshape(1, Cout).astype(jnp.float32))

    out_itemsize = np.dtype(out_dtype).itemsize
    bytes_accessed = (patches.size * patches.dtype.itemsize
                      + w_mat.size * w_mat.dtype.itemsize
                      + M_pad * Cout * out_itemsize)

    out = pl.pallas_call(
        kern,
        out_shape=jax.ShapeDtypeStruct((M_pad, Cout), out_dtype),
        grid=(M_pad // TM,),
        in_specs=in_specs,
        out_specs=pl.BlockSpec((TM, Cout), lambda i: (i, 0)),
        compiler_params=pltpu.CompilerParams(
            dimension_semantics=("parallel",),
            vmem_limit_bytes=_VMEM_LIMIT_BYTES),
        cost_estimate=pl.CostEstimate(
            flops=2 * M_pad * K * Cout,
            transcendentals=0,
            bytes_accessed=bytes_accessed),
    )(*args)
    return out[:M] if M_pad != M else out


def conv_inorm_lrelu(patches3, w_mat, *, eps, alpha, out_dtype):
    """patches3: (N, HW, K) bf16 -> (N, HW, Cout): conv + InstanceNorm + LeakyReLU."""
    N, HW, K = patches3.shape
    Cout = w_mat.shape[1]
    kern = functools.partial(_mm_inorm_lrelu_kernel, eps=eps, alpha=alpha)

    out_itemsize = np.dtype(out_dtype).itemsize
    bytes_accessed = (patches3.size * patches3.dtype.itemsize
                      + w_mat.size * w_mat.dtype.itemsize
                      + N * HW * Cout * out_itemsize)

    return pl.pallas_call(
        kern,
        out_shape=jax.ShapeDtypeStruct((N, HW, Cout), out_dtype),
        grid=(N,),
        in_specs=[
            pl.BlockSpec((1, HW, K), lambda n: (n, 0, 0)),
            pl.BlockSpec((K, Cout), lambda n: (0, 0)),
        ],
        out_specs=pl.BlockSpec((1, HW, Cout), lambda n: (n, 0, 0)),
        compiler_params=pltpu.CompilerParams(
            dimension_semantics=("parallel",),
            vmem_limit_bytes=_VMEM_LIMIT_BYTES),
        cost_estimate=pl.CostEstimate(
            flops=2 * N * HW * K * Cout,
            transcendentals=N * Cout,
            bytes_accessed=bytes_accessed),
    )(patches3, w_mat)


# ---------------------------------------------------------------------------
# Glue: im2col + per-layer driver (plain JAX reshapes / pads only)
# ---------------------------------------------------------------------------

def im2col(x_nhwc, k, stride, pad):
    """Extract (k x k) patches. Returns ((N, OH*OW, k*k*Cin), (OH, OW))."""
    x = jnp.pad(x_nhwc, ((0, 0), (pad, pad), (pad, pad), (0, 0)))
    N, Hp, Wp, C = x.shape
    OH = (Hp - k) // stride + 1
    OW = (Wp - k) // stride + 1
    pieces = []
    for di in range(k):
        for dj in range(k):
            pieces.append(
                x[:, di:di + stride * OH:stride, dj:dj + stride * OW:stride, :]
            )
    patches = jnp.concatenate(pieces, axis=-1)            # (N, OH, OW, k*k*C)
    return patches.reshape(N, OH * OW, k * k * C), (OH, OW)


def conv_layer(x_nhwc, w_oihw, bias, *, stride, pad, do_norm, do_act, out_dtype):
    Cout, Cin, kh, kw = w_oihw.shape
    # bf16 patches (halves HBM traffic); MXU accumulates in f32 inside the kernel.
    patches3, (OH, OW) = im2col(x_nhwc.astype(jnp.bfloat16), kh, stride, pad)
    N = patches3.shape[0]
    # patch element order is (kh, kw, c_in) -> reshape weight to match.
    w_mat = jnp.transpose(w_oihw, (2, 3, 1, 0)).reshape(kh * kw * Cin, Cout)
    w_mat = w_mat.astype(jnp.bfloat16)

    if do_norm:
        out = conv_inorm_lrelu(patches3, w_mat, eps=_IN_EPS, alpha=_LRELU_ALPHA,
                               out_dtype=out_dtype)
    else:
        patches = patches3.reshape(N * OH * OW, kh * kw * Cin)
        out = conv_matmul_tiled(patches, w_mat, bias, alpha=_LRELU_ALPHA,
                                use_act=do_act, out_dtype=out_dtype)
        out = out.reshape(N, OH * OW, Cout)
    return out.reshape(N, OH, OW, Cout)


def discriminator_forward(params, x_nchw, y_nchw):
    """Matches Discriminator.forward: cat on channel dim, then 5 conv blocks."""
    xy = jnp.concatenate([x_nchw, y_nchw], axis=1)           # (N, Cin+Ct, H, W)
    h = jnp.transpose(xy, (0, 2, 3, 1))                      # -> NHWC

    # Conv -> LeakyReLU
    h = conv_layer(h, params["w1"], None, stride=2, pad=1,
                   do_norm=False, do_act=True, out_dtype=jnp.bfloat16)
    # Conv -> InstanceNorm -> LeakyReLU   (x3, fused in one kernel each)
    h = conv_layer(h, params["w2"], None, stride=2, pad=1,
                   do_norm=True, do_act=True, out_dtype=jnp.bfloat16)
    h = conv_layer(h, params["w3"], None, stride=2, pad=1,
                   do_norm=True, do_act=True, out_dtype=jnp.bfloat16)
    h = conv_layer(h, params["w4"], None, stride=1, pad=1,
                   do_norm=True, do_act=True, out_dtype=jnp.bfloat16)
    # Final Conv (with bias), no activation / norm, f32 output
    h = conv_layer(h, params["w5"], params["b5"], stride=1, pad=1,
                   do_norm=False, do_act=False, out_dtype=jnp.float32)

    return jnp.transpose(h, (0, 3, 1, 2))                    # back to NCHW


def init_params(key, in_channels=3, target_channels=1, ndf=8):
    input_c = in_channels + target_channels
    ks = jax.random.split(key, 6)
    std = 0.02
    return {
        "w1": std * jax.random.normal(ks[0], (ndf, input_c, 4, 4), jnp.float32),
        "w2": std * jax.random.normal(ks[1], (ndf * 2, ndf, 4, 4), jnp.float32),
        "w3": std * jax.random.normal(ks[2], (ndf * 4, ndf * 2, 4, 4), jnp.float32),
        "w4": std * jax.random.normal(ks[3], (ndf * 8, ndf * 4, 4, 4), jnp.float32),
        "w5": std * jax.random.normal(ks[4], (1, ndf * 8, 4, 4), jnp.float32),
        "b5": std * jax.random.normal(ks[5], (1,), jnp.float32),
    }


if __name__ == "__main__":
    key = jax.random.PRNGKey(0)
    k_params, k_x, k_y = jax.random.split(key, 3)

    batch, in_c, tgt_c, ndf, H, W = 2, 3, 1, 8, 32, 32
    params = init_params(k_params, in_channels=in_c, target_channels=tgt_c, ndf=ndf)

    x = jax.random.normal(k_x, (batch, in_c, H, W), jnp.float32)   # NCHW input
    y = jax.random.normal(k_y, (batch, tgt_c, H, W), jnp.float32)  # NCHW target

    fwd = jax.jit(functools.partial(discriminator_forward, params))
    out = fwd(x, y)
    out = jax.block_until_ready(out)

    # 32 -> 16 -> 8 -> 4 -> 3 -> 2 spatial; final channels = 1
    assert out.shape == (batch, 1, 2, 2), out.shape
    assert bool(jnp.all(jnp.isfinite(out)))
    print("KERNEL_OK")
</pallas_src>

<mosaic_0001>
module attributes {stable_mosaic.version = 11 : i64} {
  func.func @_mm_epilogue_kernel(%arg0: i32, %arg1: memref<512x64xbf16, #tpu.memory_space<vmem>>, %arg2: memref<64x8xbf16, #tpu.memory_space<vmem>>, %arg3: memref<512x8xbf16, #tpu.memory_space<vmem>>) attributes {dimension_semantics = [#tpu.dimension_semantics<parallel>], iteration_bounds = array<i64: 1>, scalar_prefetch = 0 : i64, scratch_operands = 0 : i64, tpu.core_type = #tpu.core_type<tc>, window_params = [{transform_indices = @transform_0, window_bounds = array<i64: 512, 64>}, {pipeline_mode = #tpu.pipeline_mode<synchronous>, transform_indices = @transform_1, window_bounds = array<i64: 64, 8>}, {transform_indices = @transform_2, window_bounds = array<i64: 512, 8>}]} {
    %c0 = arith.constant 0 : index
    %c0_0 = arith.constant 0 : index
    %0 = vector.load %arg1[%c0, %c0_0] : memref<512x64xbf16, #tpu.memory_space<vmem>>, vector<512x64xbf16>
    %c0_1 = arith.constant 0 : index
    %c0_2 = arith.constant 0 : index
    %1 = vector.load %arg2[%c0_1, %c0_2] : memref<64x8xbf16, #tpu.memory_space<vmem>>, vector<64x8xbf16>
    %cst = arith.constant dense<0.000000e+00> : vector<512x8xf32>
    %2 = tpu.matmul %0, %1, %cst {dimension_numbers = #tpu.dot_dimension_numbers<[1], [0], [0], [1], [0, 0, 1, 1], [], []>} : vector<512x64xbf16>, vector<64x8xbf16>, vector<512x8xf32> -> vector<512x8xf32>
    %cst_3 = arith.constant 0.000000e+00 : f32
    %3 = vector.broadcast %cst_3 : f32 to vector<512x8xf32>
    %4 = arith.cmpf oge, %2, %3 : vector<512x8xf32>
    %cst_4 = arith.constant 2.000000e-01 : f32
    %5 = vector.broadcast %cst_4 : f32 to vector<512x8xf32>
    %6 = arith.mulf %5, %2 : vector<512x8xf32>
    %7 = arith.select %4, %2, %6 : vector<512x8xi1>, vector<512x8xf32>
    %8 = arith.truncf %7 : vector<512x8xf32> to vector<512x8xbf16>
    %c0_5 = arith.constant 0 : index
    %c0_6 = arith.constant 0 : index
    %9 = vector.load %arg3[%c0_5, %c0_6] : memref<512x8xbf16, #tpu.memory_space<vmem>>, vector<512x8xbf16>
    tpu.vector_store %arg3[%c0_5, %c0_6], %8 {strides = array<i32>} : memref<512x8xbf16, #tpu.memory_space<vmem>>, vector<512x8xbf16>,
    return
  }
  func.func @transform_0(%arg0: i32) -> (i32, i32) {
    %c0_i32 = arith.constant 0 : i32
    %c0_i32_0 = arith.constant 0 : i32
    return %arg0, %c0_i32 : i32, i32
  }
  func.func @transform_1(%arg0: i32) -> (i32, i32) {
    %c0_i32 = arith.constant 0 : i32
    %c0_i32_0 = arith.constant 0 : i32
    %c0_i32_1 = arith.constant 0 : i32
    return %c0_i32, %c0_i32_0 : i32, i32
  }
  func.func @transform_2(%arg0: i32) -> (i32, i32) {
    %c0_i32 = arith.constant 0 : i32
    %c0_i32_0 = arith.constant 0 : i32
    return %arg0, %c0_i32 : i32, i32
  }
}

module attributes {stable_mosaic.version = 11 : i64} {
  func.func @_mm_inorm_lrelu_kernel(%arg0: i32, %arg1: memref<1x64x128xbf16, #tpu.memory_space<vmem>>, %arg2: memref<128x16xbf16, #tpu.memory_space<vmem>>, %arg3: memref<1x64x16xbf16, #tpu.memory_space<vmem>>) attributes {dimension_semantics = [#tpu.dimension_semantics<parallel>], iteration_bounds = array<i64: 2>, scalar_prefetch = 0 : i64, scratch_operands = 0 : i64, tpu.core_type = #tpu.core_type<tc>, window_params = [{transform_indices = @transform_0, window_bounds = array<i64: 1, 64, 128>}, {pipeline_mode = #tpu.pipeline_mode<synchronous>, transform_indices = @transform_1, window_bounds = array<i64: 128, 16>}, {transform_indices = @transform_2, window_bounds = array<i64: 1, 64, 16>}]} {
    %c0 = arith.constant 0 : index
    %c0_0 = arith.constant 0 : index
    %c0_1 = arith.constant 0 : index
    %0 = vector.load %arg1[%c0, %c0_0, %c0_1] : memref<1x64x128xbf16, #tpu.memory_space<vmem>>, vector<1x64x128xbf16>
    %1 = vector.shape_cast %0 : vector<1x64x128xbf16> to vector<64x128xbf16>
    %c0_2 = arith.constant 0 : index
    %c0_3 = arith.constant 0 : index
    %2 = vector.load %arg2[%c0_2, %c0_3] : memref<128x16xbf16, #tpu.memory_space<vmem>>, vector<128x16xbf16>
    %cst = arith.constant dense<0.000000e+00> : vector<64x16xf32>
    %3 = tpu.matmul %1, %2, %cst {dimension_numbers = #tpu.dot_dimension_numbers<[1], [0], [0], [1], [0, 0, 1, 1], [], []>} : vector<64x128xbf16>, vector<128x16xbf16>, vector<64x16xf32> -> vector<64x16xf32>
    %cst_4 = arith.constant dense<0.000000e+00> : vector<16xf32>
    %4 = vector.multi_reduction <add>, %3, %cst_4 [0] : vector<64x16xf32> to vector<16xf32>
    %5 = vector.shape_cast %4 : vector<16xf32> to vector<1x16xf32>
    %cst_5 = arith.constant 6.400000e+01 : f32
    %6 = vector.broadcast %cst_5 : f32 to vector<1x16xf32>
    %7 = arith.divf %5, %6 : vector<1x16xf32>
    %8 = vector.broadcast %7 : vector<1x16xf32> to vector<64x16xf32>
    %9 = arith.subf %3, %8 : vector<64x16xf32>
    %10 = arith.mulf %9, %9 : vector<64x16xf32>
    %cst_6 = arith.constant dense<0.000000e+00> : vector<16xf32>
    %11 = vector.multi_reduction <add>, %10, %cst_6 [0] : vector<64x16xf32> to vector<16xf32>
    %12 = vector.shape_cast %11 : vector<16xf32> to vector<1x16xf32>
    %cst_7 = arith.constant 6.400000e+01 : f32
    %13 = vector.broadcast %cst_7 : f32 to vector<1x16xf32>
    %14 = arith.divf %12, %13 : vector<1x16xf32>
    %15 = vector.broadcast %7 : vector<1x16xf32> to vector<64x16xf32>
    %16 = arith.subf %3, %15 : vector<64x16xf32>
    %cst_8 = arith.constant 9.99999974E-6 : f32
    %17 = vector.broadcast %cst_8 : f32 to vector<1x16xf32>
    %18 = arith.addf %14, %17 : vector<1x16xf32>
    %19 = math.rsqrt %18 : vector<1x16xf32>
    %20 = vector.broadcast %19 : vector<1x16xf32> to vector<64x16xf32>
    %21 = arith.mulf %16, %20 : vector<64x16xf32>
    %cst_9 = arith.constant 0.000000e+00 : f32
    %22 = vector.broadcast %cst_9 : f32 to vector<64x16xf32>
    %23 = arith.cmpf oge, %21, %22 : vector<64x16xf32>
    %cst_10 = arith.constant 2.000000e-01 : f32
    %24 = vector.broadcast %cst_10 : f32 to vector<64x16xf32>
    %25 = arith.mulf %24, %21 : vector<64x16xf32>
    %26 = arith.select %23, %21, %25 : vector<64x16xi1>, vector<64x16xf32>
    %27 = arith.truncf %26 : vector<64x16xf32> to vector<64x16xbf16>
    %c0_11 = arith.constant 0 : index
    %c0_12 = arith.constant 0 : index
    %c0_13 = arith.constant 0 : index
    %28 = vector.load %arg3[%c0_11, %c0_12, %c0_13] : memref<1x64x16xbf16, #tpu.memory_space<vmem>>, vector<1x64x16xbf16>
    %29 = vector.shape_cast %28 : vector<1x64x16xbf16> to vector<64x16xbf16>
    %30 = vector.shape_cast %27 : vector<64x16xbf16> to vector<1x64x16xbf16>
    tpu.vector_store %arg3[%c0_11, %c0_12, %c0_13], %30 {strides = array<i32>} : memref<1x64x16xbf16, #tpu.memory_space<vmem>>, vector<1x64x16xbf16>,
    return
  }
  func.func @transform_0(%arg0: i32) -> (i32, i32, i32) {
    %c0_i32 = arith.constant 0 : i32
    %c0_i32_0 = arith.constant 0 : i32
    %c0_i32_1 = arith.constant 0 : i32
    return %arg0, %c0_i32, %c0_i32_0 : i32, i32, i32
  }
  func.func @transform_1(%arg0: i32) -> (i32, i32) {
    %c0_i32 = arith.constant 0 : i32
    %c0_i32_0 = arith.constant 0 : i32
    %c0_i32_1 = arith.constant 0 : i32
    return %c0_i32, %c0_i32_0 : i32, i32
  }
  func.func @transform_2(%arg0: i32) -> (i32, i32, i32) {
    %c0_i32 = arith.constant 0 : i32
    %c0_i32_0 = arith.constant 0 : i32
    %c0_i32_1 = arith.constant 0 : i32
    return %arg0, %c0_i32, %c0_i32_0 : i32, i32, i32
  }
}

module attributes {stable_mosaic.version = 11 : i64} {
  func.func @_mm_inorm_lrelu_kernel(%arg0: i32, %arg1: memref<1x16x256xbf16, #tpu.memory_space<vmem>>, %arg2: memref<256x32xbf16, #tpu.memory_space<vmem>>, %arg3: memref<1x16x32xbf16, #tpu.memory_space<vmem>>) attributes {dimension_semantics = [#tpu.dimension_semantics<parallel>], iteration_bounds = array<i64: 2>, scalar_prefetch = 0 : i64, scratch_operands = 0 : i64, tpu.core_type = #tpu.core_type<tc>, window_params = [{transform_indices = @transform_0, window_bounds = array<i64: 1, 16, 256>}, {pipeline_mode = #tpu.pipeline_mode<synchronous>, transform_indices = @transform_1, window_bounds = array<i64: 256, 32>}, {transform_indices = @transform_2, window_bounds = array<i64: 1, 16, 32>}]} {
    %c0 = arith.constant 0 : index
    %c0_0 = arith.constant 0 : index
    %c0_1 = arith.constant 0 : index
    %0 = vector.load %arg1[%c0, %c0_0, %c0_1] : memref<1x16x256xbf16, #tpu.memory_space<vmem>>, vector<1x16x256xbf16>
    %1 = vector.shape_cast %0 : vector<1x16x256xbf16> to vector<16x256xbf16>
    %c0_2 = arith.constant 0 : index
    %c0_3 = arith.constant 0 : index
    %2 = vector.load %arg2[%c0_2, %c0_3] : memref<256x32xbf16, #tpu.memory_space<vmem>>, vector<256x32xbf16>
    %cst = arith.constant dense<0.000000e+00> : vector<16x32xf32>
    %3 = tpu.matmul %1, %2, %cst {dimension_numbers = #tpu.dot_dimension_numbers<[1], [0], [0], [1], [0, 0, 1, 1], [], []>} : vector<16x256xbf16>, vector<256x32xbf16>, vector<16x32xf32> -> vector<16x32xf32>
    %cst_4 = arith.constant dense<0.000000e+00> : vector<32xf32>
    %4 = vector.multi_reduction <add>, %3, %cst_4 [0] : vector<16x32xf32> to vector<32xf32>
    %5 = vector.shape_cast %4 : vector<32xf32> to vector<1x32xf32>
    %cst_5 = arith.constant 1.600000e+01 : f32
    %6 = vector.broadcast %cst_5 : f32 to vector<1x32xf32>
    %7 = arith.divf %5, %6 : vector<1x32xf32>
    %8 = vector.broadcast %7 : vector<1x32xf32> to vector<16x32xf32>
    %9 = arith.subf %3, %8 : vector<16x32xf32>
    %10 = arith.mulf %9, %9 : vector<16x32xf32>
    %cst_6 = arith.constant dense<0.000000e+00> : vector<32xf32>
    %11 = vector.multi_reduction <add>, %10, %cst_6 [0] : vector<16x32xf32> to vector<32xf32>
    %12 = vector.shape_cast %11 : vector<32xf32> to vector<1x32xf32>
    %cst_7 = arith.constant 1.600000e+01 : f32
    %13 = vector.broadcast %cst_7 : f32 to vector<1x32xf32>
    %14 = arith.divf %12, %13 : vector<1x32xf32>
    %15 = vector.broadcast %7 : vector<1x32xf32> to vector<16x32xf32>
    %16 = arith.subf %3, %15 : vector<16x32xf32>
    %cst_8 = arith.constant 9.99999974E-6 : f32
    %17 = vector.broadcast %cst_8 : f32 to vector<1x32xf32>
    %18 = arith.addf %14, %17 : vector<1x32xf32>
    %19 = math.rsqrt %18 : vector<1x32xf32>
    %20 = vector.broadcast %19 : vector<1x32xf32> to vector<16x32xf32>
    %21 = arith.mulf %16, %20 : vector<16x32xf32>
    %cst_9 = arith.constant 0.000000e+00 : f32
    %22 = vector.broadcast %cst_9 : f32 to vector<16x32xf32>
    %23 = arith.cmpf oge, %21, %22 : vector<16x32xf32>
    %cst_10 = arith.constant 2.000000e-01 : f32
    %24 = vector.broadcast %cst_10 : f32 to vector<16x32xf32>
    %25 = arith.mulf %24, %21 : vector<16x32xf32>
    %26 = arith.select %23, %21, %25 : vector<16x32xi1>, vector<16x32xf32>
    %27 = arith.truncf %26 : vector<16x32xf32> to vector<16x32xbf16>
    %c0_11 = arith.constant 0 : index
    %c0_12 = arith.constant 0 : index
    %c0_13 = arith.constant 0 : index
    %28 = vector.load %arg3[%c0_11, %c0_12, %c0_13] : memref<1x16x32xbf16, #tpu.memory_space<vmem>>, vector<1x16x32xbf16>
    %29 = vector.shape_cast %28 : vector<1x16x32xbf16> to vector<16x32xbf16>
    %30 = vector.shape_cast %27 : vector<16x32xbf16> to vector<1x16x32xbf16>
    tpu.vector_store %arg3[%c0_11, %c0_12, %c0_13], %30 {strides = array<i32>} : memref<1x16x32xbf16, #tpu.memory_space<vmem>>, vector<1x16x32xbf16>,
    return
  }
  func.func @transform_0(%arg0: i32) -> (i32, i32, i32) {
    %c0_i32 = arith.constant 0 : i32
    %c0_i32_0 = arith.constant 0 : i32
    %c0_i32_1 = arith.constant 0 : i32
    return %arg0, %c0_i32, %c0_i32_0 : i32, i32, i32
  }
  func.func @transform_1(%arg0: i32) -> (i32, i32) {
    %c0_i32 = arith.constant 0 : i32
    %c0_i32_0 = arith.constant 0 : i32
    %c0_i32_1 = arith.constant 0 : i32
    return %c0_i32, %c0_i32_0 : i32, i32
  }
  func.func @transform_2(%arg0: i32) -> (i32, i32, i32) {
    %c0_i32 = arith.constant 0 : i32
    %c0_i32_0 = arith.constant 0 : i32
    %c0_i32_1 = arith.constant 0 : i32
    return %arg0, %c0_i32, %c0_i32_0 : i32, i32, i32
  }
}

module attributes {stable_mosaic.version = 11 : i64} {
  func.func @_mm_inorm_lrelu_kernel(%arg0: i32, %arg1: memref<1x9x512xbf16, #tpu.memory_space<vmem>>, %arg2: memref<512x64xbf16, #tpu.memory_space<vmem>>, %arg3: memref<1x9x64xbf16, #tpu.memory_space<vmem>>) attributes {dimension_semantics = [#tpu.dimension_semantics<parallel>], iteration_bounds = array<i64: 2>, scalar_prefetch = 0 : i64, scratch_operands = 0 : i64, tpu.core_type = #tpu.core_type<tc>, window_params = [{transform_indices = @transform_0, window_bounds = array<i64: 1, 9, 512>}, {pipeline_mode = #tpu.pipeline_mode<synchronous>, transform_indices = @transform_1, window_bounds = array<i64: 512, 64>}, {transform_indices = @transform_2, window_bounds = array<i64: 1, 9, 64>}]} {
    %c0 = arith.constant 0 : index
    %c0_0 = arith.constant 0 : index
    %c0_1 = arith.constant 0 : index
    %0 = vector.load %arg1[%c0, %c0_0, %c0_1] : memref<1x9x512xbf16, #tpu.memory_space<vmem>>, vector<1x9x512xbf16>
    %1 = vector.shape_cast %0 : vector<1x9x512xbf16> to vector<9x512xbf16>
    %c0_2 = arith.constant 0 : index
    %c0_3 = arith.constant 0 : index
    %2 = vector.load %arg2[%c0_2, %c0_3] : memref<512x64xbf16, #tpu.memory_space<vmem>>, vector<512x64xbf16>
    %cst = arith.constant dense<0.000000e+00> : vector<9x64xf32>
    %3 = tpu.matmul %1, %2, %cst {dimension_numbers = #tpu.dot_dimension_numbers<[1], [0], [0], [1], [0, 0, 1, 1], [], []>} : vector<9x512xbf16>, vector<512x64xbf16>, vector<9x64xf32> -> vector<9x64xf32>
    %cst_4 = arith.constant dense<0.000000e+00> : vector<64xf32>
    %4 = vector.multi_reduction <add>, %3, %cst_4 [0] : vector<9x64xf32> to vector<64xf32>
    %5 = vector.shape_cast %4 : vector<64xf32> to vector<1x64xf32>
    %cst_5 = arith.constant 9.000000e+00 : f32
    %6 = vector.broadcast %cst_5 : f32 to vector<1x64xf32>
    %7 = arith.divf %5, %6 : vector<1x64xf32>
    %8 = vector.broadcast %7 : vector<1x64xf32> to vector<9x64xf32>
    %9 = arith.subf %3, %8 : vector<9x64xf32>
    %10 = arith.mulf %9, %9 : vector<9x64xf32>
    %cst_6 = arith.constant dense<0.000000e+00> : vector<64xf32>
    %11 = vector.multi_reduction <add>, %10, %cst_6 [0] : vector<9x64xf32> to vector<64xf32>
    %12 = vector.shape_cast %11 : vector<64xf32> to vector<1x64xf32>
    %cst_7 = arith.constant 9.000000e+00 : f32
    %13 = vector.broadcast %cst_7 : f32 to vector<1x64xf32>
    %14 = arith.divf %12, %13 : vector<1x64xf32>
    %15 = vector.broadcast %7 : vector<1x64xf32> to vector<9x64xf32>
    %16 = arith.subf %3, %15 : vector<9x64xf32>
    %cst_8 = arith.constant 9.99999974E-6 : f32
    %17 = vector.broadcast %cst_8 : f32 to vector<1x64xf32>
    %18 = arith.addf %14, %17 : vector<1x64xf32>
    %19 = math.rsqrt %18 : vector<1x64xf32>
    %20 = vector.broadcast %19 : vector<1x64xf32> to vector<9x64xf32>
    %21 = arith.mulf %16, %20 : vector<9x64xf32>
    %cst_9 = arith.constant 0.000000e+00 : f32
    %22 = vector.broadcast %cst_9 : f32 to vector<9x64xf32>
    %23 = arith.cmpf oge, %21, %22 : vector<9x64xf32>
    %cst_10 = arith.constant 2.000000e-01 : f32
    %24 = vector.broadcast %cst_10 : f32 to vector<9x64xf32>
    %25 = arith.mulf %24, %21 : vector<9x64xf32>
    %26 = arith.select %23, %21, %25 : vector<9x64xi1>, vector<9x64xf32>
    %27 = arith.truncf %26 : vector<9x64xf32> to vector<9x64xbf16>
    %c0_11 = arith.constant 0 : index
    %c0_12 = arith.constant 0 : index
    %c0_13 = arith.constant 0 : index
    %28 = vector.load %arg3[%c0_11, %c0_12, %c0_13] : memref<1x9x64xbf16, #tpu.memory_space<vmem>>, vector<1x9x64xbf16>
    %29 = vector.shape_cast %28 : vector<1x9x64xbf16> to vector<9x64xbf16>
    %30 = vector.shape_cast %27 : vector<9x64xbf16> to vector<1x9x64xbf16>
    tpu.vector_store %arg3[%c0_11, %c0_12, %c0_13], %30 {strides = array<i32>} : memref<1x9x64xbf16, #tpu.memory_space<vmem>>, vector<1x9x64xbf16>,
    return
  }
  func.func @transform_0(%arg0: i32) -> (i32, i32, i32) {
    %c0_i32 = arith.constant 0 : i32
    %c0_i32_0 = arith.constant 0 : i32
    %c0_i32_1 = arith.constant 0 : i32
    return %arg0, %c0_i32, %c0_i32_0 : i32, i32, i32
  }
  func.func @transform_1(%arg0: i32) -> (i32, i32) {
    %c0_i32 = arith.constant 0 : i32
    %c0_i32_0 = arith.constant 0 : i32
    %c0_i32_1 = arith.constant 0 : i32
    return %c0_i32, %c0_i32_0 : i32, i32
  }
  func.func @transform_2(%arg0: i32) -> (i32, i32, i32) {
    %c0_i32 = arith.constant 0 : i32
    %c0_i32_0 = arith.constant 0 : i32
    %c0_i32_1 = arith.constant 0 : i32
    return %arg0, %c0_i32, %c0_i32_0 : i32, i32, i32
  }
}

module attributes {stable_mosaic.version = 11 : i64} {
  func.func @_mm_epilogue_kernel(%arg0: i32, %arg1: memref<8x1024xbf16, #tpu.memory_space<vmem>>, %arg2: memref<1024x1xbf16, #tpu.memory_space<vmem>>, %arg3: memref<1x1xf32, #tpu.memory_space<vmem>>, %arg4: memref<8x1xf32, #tpu.memory_space<vmem>>) attributes {dimension_semantics = [#tpu.dimension_semantics<parallel>], iteration_bounds = array<i64: 1>, scalar_prefetch = 0 : i64, scratch_operands = 0 : i64, tpu.core_type = #tpu.core_type<tc>, window_params = [{transform_indices = @transform_0, window_bounds = array<i64: 8, 1024>}, {pipeline_mode = #tpu.pipeline_mode<synchronous>, transform_indices = @transform_1, window_bounds = array<i64: 1024, 1>}, {pipeline_mode = #tpu.pipeline_mode<synchronous>, transform_indices = @transform_2, window_bounds = array<i64: 1, 1>}, {transform_indices = @transform_3, window_bounds = array<i64: 8, 1>}]} {
    %c0 = arith.constant 0 : index
    %c0_0 = arith.constant 0 : index
    %0 = vector.load %arg1[%c0, %c0_0] : memref<8x1024xbf16, #tpu.memory_space<vmem>>, vector<8x1024xbf16>
    %c0_1 = arith.constant 0 : index
    %c0_2 = arith.constant 0 : index
    %1 = vector.load %arg2[%c0_1, %c0_2] : memref<1024x1xbf16, #tpu.memory_space<vmem>>, vector<1024x1xbf16>
    %cst = arith.constant dense<0.000000e+00> : vector<8x1xf32>
    %2 = tpu.matmul %0, %1, %cst {dimension_numbers = #tpu.dot_dimension_numbers<[1], [0], [0], [1], [0, 0, 1, 1], [], []>} : vector<8x1024xbf16>, vector<1024x1xbf16>, vector<8x1xf32> -> vector<8x1xf32>
    %c0_3 = arith.constant 0 : index
    %c0_4 = arith.constant 0 : index
    %3 = vector.load %arg3[%c0_3, %c0_4] : memref<1x1xf32, #tpu.memory_space<vmem>>, vector<1x1xf32>
    %4 = vector.broadcast %3 : vector<1x1xf32> to vector<8x1xf32>
    %5 = arith.addf %2, %4 : vector<8x1xf32>
    %c0_5 = arith.constant 0 : index
    %c0_6 = arith.constant 0 : index
    %6 = vector.load %arg4[%c0_5, %c0_6] : memref<8x1xf32, #tpu.memory_space<vmem>>, vector<8x1xf32>
    tpu.vector_store %arg4[%c0_5, %c0_6], %5 {strides = array<i32>} : memref<8x1xf32, #tpu.memory_space<vmem>>, vector<8x1xf32>,
    return
  }
  func.func @transform_0(%arg0: i32) -> (i32, i32) {
    %c0_i32 = arith.constant 0 : i32
    %c0_i32_0 = arith.constant 0 : i32
    return %arg0, %c0_i32 : i32, i32
  }
  func.func @transform_1(%arg0: i32) -> (i32, i32) {
    %c0_i32 = arith.constant 0 : i32
    %c0_i32_0 = arith.constant 0 : i32
    %c0_i32_1 = arith.constant 0 : i32
    return %c0_i32, %c0_i32_0 : i32, i32
  }
  func.func @transform_2(%arg0: i32) -> (i32, i32) {
    %c0_i32 = arith.constant 0 : i32
    %c0_i32_0 = arith.constant 0 : i32
    %c0_i32_1 = arith.constant 0 : i32
    return %c0_i32, %c0_i32_0 : i32, i32
  }
  func.func @transform_3(%arg0: i32) -> (i32, i32) {
    %c0_i32 = arith.constant 0 : i32
    %c0_i32_0 = arith.constant 0 : i32
    return %arg0, %c0_i32 : i32, i32
  }
}

</mosaic_0001>

<bundles_post_ra>
// kernel: discriminator_forward.5
= control target key start
LH: loop header
LB: loop body
LE: loop exit
PB: predicated region body
PF: predicated region fallthrough
CT: control target
= control target key end

     0   :  { %vm268_vm0 = vcmask 523264   ;;  %vm790_vm3 = vcmask 60416   ;;  %s1494_s1 = inlined_call_operand.vmem [shape: bf16[64,8], index: 1, kind: input, shape index: {}]   ;;  %s1495_s0 = inlined_call_operand.vmem [shape: bf16[512,64], index: 0, kind: input, shape index: {}]   ;;  %s1496_s2 = inlined_call_operand.vmem [shape: bf16[512,8], index: 2, kind: output, shape index: {}]  }
   0x1   :  { %v1070_v0 = vld [vmem:[%s1494_s1 + $0x18] sm:$0xff]  ;;  %v1069_v1 = vld [vmem:[%s1494_s1 + $0x10] sm:$0xff]  ;;  %v1068_v2 = vld [vmem:[%s1494_s1 + $0x8] sm:$0xff] }
   0x2   :  { %369 = vmatpush.bf16.msra.mxu0 %v1070_v0  ;;  %1071 = vmatpush.bf16.msra.mxu1 %v1070_v0  ;;  %v1067_v3 = vld [vmem:[%s1494_s1] sm:$0xff]  ;;  %v1036_v8 = vld [vmem:[%s1495_s0 + $0x8] sm:$0xff]  ;;  %v1037_v12 = vld [vmem:[%s1495_s0 + $0x10] sm:$0xff] }
   0x3   :  { %1072 = vmatpush.bf16.msra.mxu2 %v1070_v0  ;;  %1073 = vmatpush.bf16.msra.mxu3 %v1070_v0  ;;  %v1035_v4 = vld [vmem:[%s1495_s0] sm:$0xff]  ;;  %v1044_v9 = vld [vmem:[%s1495_s0 + $0x48] sm:$0xff]  ;;  %v1045_v13 = vld [vmem:[%s1495_s0 + $0x50] sm:$0xff] }
   0x4   :  { %v1043_v5 = vld [vmem:[%s1495_s0 + $0x40] sm:$0xff]  ;;  %v1052_v10 = vld [vmem:[%s1495_s0 + $0x88] sm:$0xff]  ;;  %v1053_v14 = vld [vmem:[%s1495_s0 + $0x90] sm:$0xff] }
   0x5   :  { %v1051_v6 = vld [vmem:[%s1495_s0 + $0x80] sm:$0xff]  ;;  %v1060_v11 = vld [vmem:[%s1495_s0 + $0xc8] sm:$0xff]  ;;  %v1061_v15 = vld [vmem:[%s1495_s0 + $0xd0] sm:$0xff] }
   0x6   :  { %370 = vmatpush.bf16.msra.mxu0 %v1069_v1  ;;  %1074 = vmatpush.bf16.msra.mxu1 %v1069_v1  ;;  %v1059_v7 = vld [vmem:[%s1495_s0 + $0xc0] sm:$0xff]  ;;  %v1038_v16 = vld [vmem:[%s1495_s0 + $0x18] sm:$0xff]  ;;  %v1040_v24 = vld [vmem:[%s1495_s0 + $0x28] sm:$0xff] }
   0x7   :  { %1075 = vmatpush.bf16.msra.mxu2 %v1069_v1  ;;  %1076 = vmatpush.bf16.msra.mxu3 %v1069_v1  ;;  %v1046_v17 = vld [vmem:[%s1495_s0 + $0x58] sm:$0xff]  ;;  %v1039_v20 = vld [vmem:[%s1495_s0 + $0x20] sm:$0xff]  ;;  %v1048_v25 = vld [vmem:[%s1495_s0 + $0x68] sm:$0xff] }
   0x8   :  { %v1054_v18 = vld [vmem:[%s1495_s0 + $0x98] sm:$0xff]  ;;  %v1047_v21 = vld [vmem:[%s1495_s0 + $0x60] sm:$0xff]  ;;  %v1056_v26 = vld [vmem:[%s1495_s0 + $0xa8] sm:$0xff] }
   0x9   :  { %v1062_v19 = vld [vmem:[%s1495_s0 + $0xd8] sm:$0xff]  ;;  %v1055_v22 = vld [vmem:[%s1495_s0 + $0xa0] sm:$0xff]  ;;  %v1064_v27 = vld [vmem:[%s1495_s0 + $0xe8] sm:$0xff] }
   0xa   :  { %371 = vmatpush.bf16.msra.mxu0 %v1068_v2  ;;  %1077 = vmatpush.bf16.msra.mxu1 %v1068_v2  ;;  %v1063_v23 = vld [vmem:[%s1495_s0 + $0xe0] sm:$0xff]  ;;  %v1041_v28 = vld [vmem:[%s1495_s0 + $0x30] sm:$0xff]  ;;  %v1042_v32 = vld [vmem:[%s1495_s0 + $0x38] sm:$0xff] }
   0xb   :  { %1078 = vmatpush.bf16.msra.mxu2 %v1068_v2  ;;  %1079 = vmatpush.bf16.msra.mxu3 %v1068_v2  ;;  %v1049_v29 = vld [vmem:[%s1495_s0 + $0x70] sm:$0xff]  ;;  %v1050_v33 = vld [vmem:[%s1495_s0 + $0x78] sm:$0xff] }
   0xc   :  { %v1057_v30 = vld [vmem:[%s1495_s0 + $0xb0] sm:$0xff]  ;;  %v1058_v34 = vld [vmem:[%s1495_s0 + $0xb8] sm:$0xff] }
   0xd   :  { %v1065_v31 = vld [vmem:[%s1495_s0 + $0xf0] sm:$0xff]  ;;  %v1066_v35 = vld [vmem:[%s1495_s0 + $0xf8] sm:$0xff] }
   0xe   :  { %372 = vmatpush.bf16.msra.mxu0 %v1067_v3  ;;  %1080 = vmatpush.bf16.msra.mxu1 %v1067_v3 }
   0xf   :  { %1081 = vmatpush.bf16.msra.mxu2 %v1067_v3  ;;  %1082 = vmatpush.bf16.msra.mxu3 %v1067_v3 }
  0x11   :  { %1003 = vmatmul.msk.bf16.vlgmr.msra.gmra.mxu0 %vm268_vm0, %v1035_v4  ;;  %1011 = vmatmul.msk.bf16.vlgmr.msra.gmra.mxu1 %vm268_vm0, %v1043_v5 }
  0x12   :  { %1019 = vmatmul.msk.bf16.vlgmr.msra.gmra.mxu2 %vm268_vm0, %v1051_v6  ;;  %1027 = vmatmul.msk.bf16.vlgmr.msra.gmra.mxu3 %vm268_vm0, %v1059_v7 }
  0x21   :  { %1004 = vmatmul.msk.bf16.gmra.mxu0 %vm268_vm0, %v1036_v8  ;;  %1012 = vmatmul.msk.bf16.gmra.mxu1 %vm268_vm0, %v1044_v9 }
  0x22   :  { %1020 = vmatmul.msk.bf16.gmra.mxu2 %vm268_vm0, %v1052_v10  ;;  %1028 = vmatmul.msk.bf16.gmra.mxu3 %vm268_vm0, %v1060_v11 }
  0x31   :  { %1005 = vmatmul.msk.bf16.gmra.mxu0 %vm268_vm0, %v1037_v12  ;;  %1013 = vmatmul.msk.bf16.gmra.mxu1 %vm268_vm0, %v1045_v13 }
  0x32   :  { %1021 = vmatmul.msk.bf16.gmra.mxu2 %vm268_vm0, %v1053_v14  ;;  %1029 = vmatmul.msk.bf16.gmra.mxu3 %vm268_vm0, %v1061_v15 }
  0x41   :  { %1006 = vmatmul.msk.bf16.gmra.mxu0 %vm268_vm0, %v1038_v16  ;;  %1014 = vmatmul.msk.bf16.gmra.mxu1 %vm268_vm0, %v1046_v17 }
  0x42   :  { %1022 = vmatmul.msk.bf16.gmra.mxu2 %vm268_vm0, %v1054_v18  ;;  %1030 = vmatmul.msk.bf16.gmra.mxu3 %vm268_vm0, %v1062_v19 }
  0x51   :  { %1007 = vmatmul.msk.bf16.gmra.mxu0 %vm268_vm0, %v1039_v20  ;;  %1015 = vmatmul.msk.bf16.gmra.mxu1 %vm268_vm0, %v1047_v21 }
  0x52   :  { %1023 = vmatmul.msk.bf16.gmra.mxu2 %vm268_vm0, %v1055_v22  ;;  %1031 = vmatmul.msk.bf16.gmra.mxu3 %vm268_vm0, %v1063_v23 }
  0x61   :  { %1008 = vmatmul.msk.bf16.gmra.mxu0 %vm268_vm0, %v1040_v24  ;;  %1016 = vmatmul.msk.bf16.gmra.mxu1 %vm268_vm0, %v1048_v25 }
  0x62   :  { %1024 = vmatmul.msk.bf16.gmra.mxu2 %vm268_vm0, %v1056_v26  ;;  %1032 = vmatmul.msk.bf16.gmra.mxu3 %vm268_vm0, %v1064_v27 }
  0x71   :  { %1009 = vmatmul.msk.bf16.gmra.mxu0 %vm268_vm0, %v1041_v28  ;;  %1017 = vmatmul.msk.bf16.gmra.mxu1 %vm268_vm0, %v1049_v29 }
  0x72   :  { %1025 = vmatmul.msk.bf16.gmra.mxu2 %vm268_vm0, %v1057_v30  ;;  %1033 = vmatmul.msk.bf16.gmra.mxu3 %vm268_vm0, %v1065_v31 }
  0x81   :  { %1010 = vmatmul.msk.bf16.gmra.mxu0 %vm268_vm0, %v1042_v32  ;;  %1018 = vmatmul.msk.bf16.gmra.mxu1 %vm268_vm0, %v1050_v33 }
  0x82   :  { %1026 = vmatmul.msk.bf16.gmra.mxu2 %vm268_vm0, %v1058_v34  ;;  %1034 = vmatmul.msk.bf16.gmra.mxu3 %vm268_vm0, %v1066_v35 }
  0x8e   :  { %v374_v36 = vpop.f32.mrf.mxu0  ;;  %v414_v37 = vpop.f32.mrf.mxu1 }
  0x8f   :  { %vm534_vm1 = vcmp.ge.f32.partialorder %v374_v36, 0.0  ;;  %v598_v38 = vmul.f32 0.2, %v374_v36  ;;  %vm550_vm2 = vcmp.ge.f32.partialorder %v414_v37, 0.0  ;;  %v614_v39 = vmul.f32 0.2, %v414_v37 }
  0x91   :  { %v662_v40 = vsel %vm534_vm1, %v374_v36, %v598_v38  ;;  %v678_v41 = vsel %vm550_vm2, %v414_v37, %v614_v39 }
  0x92   :  { %v726_v42 = vpack.c.bf16 %v662_v40, %v662_v40  ;;  %v742_v43 = vpack.c.bf16 %v678_v41, %v678_v41 }
  0x94   :  { %791 = vst.msk [vmem:[%s1496_s2] sm:$0xf] %vm790_vm3, %v726_v42 }
  0x95   :  { %807 = vst.msk [vmem:[%s1496_s2 + $0x40] sm:$0xf] %vm790_vm3, %v742_v43  ;;  %v454_v44 = vpop.f32.mrf.mxu2  ;;  %v494_v45 = vpop.f32.mrf.mxu3 }
  0x96   :  { %vm566_vm4 = vcmp.ge.f32.partialorder %v454_v44, 0.0  ;;  %v630_v46 = vmul.f32 0.2, %v454_v44  ;;  %vm582_vm5 = vcmp.ge.f32.partialorder %v494_v45, 0.0  ;;  %v646_v47 = vmul.f32 0.2, %v494_v45  ;;  %v376_v48 = vpop.f32.mrf.mxu0  ;;  %v416_v49 = vpop.f32.mrf.mxu1 }
  0x97   :  { %vm535_vm6 = vcmp.ge.f32.partialorder %v376_v48, 0.0  ;;  %v599_v50 = vmul.f32 0.2, %v376_v48  ;;  %vm551_vm7 = vcmp.ge.f32.partialorder %v416_v49, 0.0  ;;  %v615_v51 = vmul.f32 0.2, %v416_v49 }
  0x98   :  { %v694_v52 = vsel %vm566_vm4, %v454_v44, %v630_v46  ;;  %v710_v53 = vsel %vm582_vm5, %v494_v45, %v646_v47 }
  0x99   :  { %v758_v54 = vpack.c.bf16 %v694_v52, %v694_v52  ;;  %v774_v55 = vpack.c.bf16 %v710_v53, %v710_v53  ;;  %v663_v56 = vsel %vm535_vm6, %v376_v48, %v599_v50  ;;  %v679_v57 = vsel %vm551_vm7, %v416_v49, %v615_v51 }
  0x9a   :  { %v727_v58 = vpack.c.bf16 %v663_v56, %v663_v56  ;;  %v743_v59 = vpack.c.bf16 %v679_v57, %v679_v57 }
  0x9b   :  { %823 = vst.msk [vmem:[%s1496_s2 + $0x80] sm:$0xf] %vm790_vm3, %v758_v54 }
  0x9c   :  { %839 = vst.msk [vmem:[%s1496_s2 + $0xc0] sm:$0xf] %vm790_vm3, %v774_v55 }
  0x9d   :  { %792 = vst.msk [vmem:[%s1496_s2 + $0x4] sm:$0xf] %vm790_vm3, %v727_v58  ;;  %v456_v60 = vpop.f32.mrf.mxu2  ;;  %v496_v61 = vpop.f32.mrf.mxu3 }
  0x9e   :  { %808 = vst.msk [vmem:[%s1496_s2 + $0x44] sm:$0xf] %vm790_vm3, %v743_v59  ;;  %vm567_vm8 = vcmp.ge.f32.partialorder %v456_v60, 0.0  ;;  %v631_v62 = vmul.f32 0.2, %v456_v60  ;;  %vm583_vm9 = vcmp.ge.f32.partialorder %v496_v61, 0.0  ;;  %v379_v63 = vpop.f32.mrf.mxu0  ;;  %v419_v0 = vpop.f32.mrf.mxu1 }
  0x9f   :  { %v647_v1 = vmul.f32 0.2, %v496_v61  ;;  %vm536_vm10 = vcmp.ge.f32.partialorder %v379_v63, 0.0  ;;  %v600_v2 = vmul.f32 0.2, %v379_v63  ;;  %vm552_vm11 = vcmp.ge.f32.partialorder %v419_v0, 0.0 }
  0xa0   :  { %v695_v3 = vsel %vm567_vm8, %v456_v60, %v631_v62  ;;  %v616_v4 = vmul.f32 0.2, %v419_v0 }
  0xa1   :  { %v759_v5 = vpack.c.bf16 %v695_v3, %v695_v3  ;;  %v711_v6 = vsel %vm583_vm9, %v496_v61, %v647_v1  ;;  %v664_v7 = vsel %vm536_vm10, %v379_v63, %v600_v2 }
  0xa2   :  { %v775_v8 = vpack.c.bf16 %v711_v6, %v711_v6  ;;  %v728_v9 = vpack.c.bf16 %v664_v7, %v664_v7  ;;  %v680_v10 = vsel %vm552_vm11, %v419_v0, %v616_v4 }
  0xa3   :  { %824 = vst.msk [vmem:[%s1496_s2 + $0x84] sm:$0xf] %vm790_vm3, %v759_v5  ;;  %v744_v11 = vpack.c.bf16 %v680_v10, %v680_v10 }
  0xa4   :  { %840 = vst.msk [vmem:[%s1496_s2 + $0xc4] sm:$0xf] %vm790_vm3, %v775_v8 }
  0xa5   :  { %793 = vst.msk [vmem:[%s1496_s2 + $0x8] sm:$0xf] %vm790_vm3, %v728_v9  ;;  %v459_v12 = vpop.f32.mrf.mxu2  ;;  %v499_v13 = vpop.f32.mrf.mxu3 }
  0xa6   :  { %809 = vst.msk [vmem:[%s1496_s2 + $0x48] sm:$0xf] %vm790_vm3, %v744_v11  ;;  %vm568_vm12 = vcmp.ge.f32.partialorder %v459_v12, 0.0  ;;  %v632_v14 = vmul.f32 0.2, %v459_v12  ;;  %vm584_vm13 = vcmp.ge.f32.partialorder %v499_v13, 0.0  ;;  %v381_v15 = vpop.f32.mrf.mxu0  ;;  %v421_v16 = vpop.f32.mrf.mxu1 }
  0xa7   :  { %v648_v17 = vmul.f32 0.2, %v499_v13  ;;  %vm537_vm14 = vcmp.ge.f32.partialorder %v381_v15, 0.0  ;;  %v601_v18 = vmul.f32 0.2, %v381_v15  ;;  %vm553_vm15 = vcmp.ge.f32.partialorder %v421_v16, 0.0 }
  0xa8   :  { %v696_v19 = vsel %vm568_vm12, %v459_v12, %v632_v14  ;;  %v617_v20 = vmul.f32 0.2, %v421_v16 }
  0xa9   :  { %v760_v21 = vpack.c.bf16 %v696_v19, %v696_v19  ;;  %v712_v22 = vsel %vm584_vm13, %v499_v13, %v648_v17  ;;  %v665_v23 = vsel %vm537_vm14, %v381_v15, %v601_v18 }
  0xaa   :  { %v776_v24 = vpack.c.bf16 %v712_v22, %v712_v22  ;;  %v729_v25 = vpack.c.bf16 %v665_v23, %v665_v23  ;;  %v681_v26 = vsel %vm553_vm15, %v421_v16, %v617_v20 }
  0xab   :  { %825 = vst.msk [vmem:[%s1496_s2 + $0x88] sm:$0xf] %vm790_vm3, %v760_v21  ;;  %v745_v27 = vpack.c.bf16 %v681_v26, %v681_v26 }
  0xac   :  { %841 = vst.msk [vmem:[%s1496_s2 + $0xc8] sm:$0xf] %vm790_vm3, %v776_v24 }
  0xad   :  { %794 = vst.msk [vmem:[%s1496_s2 + $0xc] sm:$0xf] %vm790_vm3, %v729_v25  ;;  %v461_v28 = vpop.f32.mrf.mxu2  ;;  %v501_v29 = vpop.f32.mrf.mxu3 }
  0xae   :  { %810 = vst.msk [vmem:[%s1496_s2 + $0x4c] sm:$0xf] %vm790_vm3, %v745_v27  ;;  %vm569_vm0 = vcmp.ge.f32.partialorder %v461_v28, 0.0  ;;  %v633_v30 = vmul.f32 0.2, %v461_v28  ;;  %vm585_vm1 = vcmp.ge.f32.partialorder %v501_v29, 0.0  ;;  %v384_v31 = vpop.f32.mrf.mxu0  ;;  %v424_v32 = vpop.f32.mrf.mxu1 }
  0xaf   :  { %v649_v33 = vmul.f32 0.2, %v501_v29  ;;  %vm538_vm2 = vcmp.ge.f32.partialorder %v384_v31, 0.0  ;;  %v602_v34 = vmul.f32 0.2, %v384_v31  ;;  %vm554_vm4 = vcmp.ge.f32.partialorder %v424_v32, 0.0 }
  0xb0   :  { %v697_v35 = vsel %vm569_vm0, %v461_v28, %v633_v30  ;;  %v618_v36 = vmul.f32 0.2, %v424_v32 }
  0xb1   :  { %v761_v37 = vpack.c.bf16 %v697_v35, %v697_v35  ;;  %v713_v38 = vsel %vm585_vm1, %v501_v29, %v649_v33  ;;  %v666_v39 = vsel %vm538_vm2, %v384_v31, %v602_v34 }
  0xb2   :  { %v777_v40 = vpack.c.bf16 %v713_v38, %v713_v38  ;;  %v730_v41 = vpack.c.bf16 %v666_v39, %v666_v39  ;;  %v682_v42 = vsel %vm554_vm4, %v424_v32, %v618_v36 }
  0xb3   :  { %826 = vst.msk [vmem:[%s1496_s2 + $0x8c] sm:$0xf] %vm790_vm3, %v761_v37  ;;  %v746_v43 = vpack.c.bf16 %v682_v42, %v682_v42 }
  0xb4   :  { %842 = vst.msk [vmem:[%s1496_s2 + $0xcc] sm:$0xf] %vm790_vm3, %v777_v40 }
  0xb5   :  { %795 = vst.msk [vmem:[%s1496_s2 + $0x10] sm:$0xf] %vm790_vm3, %v730_v41  ;;  %v464_v44 = vpop.f32.mrf.mxu2  ;;  %v504_v45 = vpop.f32.mrf.mxu3 }
  0xb6   :  { %811 = vst.msk [vmem:[%s1496_s2 + $0x50] sm:$0xf] %vm790_vm3, %v746_v43  ;;  %vm570_vm5 = vcmp.ge.f32.partialorder %v464_v44, 0.0  ;;  %v634_v46 = vmul.f32 0.2, %v464_v44  ;;  %vm586_vm6 = vcmp.ge.f32.partialorder %v504_v45, 0.0  ;;  %v386_v47 = vpop.f32.mrf.mxu0  ;;  %v426_v48 = vpop.f32.mrf.mxu1 }
  0xb7   :  { %v650_v49 = vmul.f32 0.2, %v504_v45  ;;  %vm539_vm7 = vcmp.ge.f32.partialorder %v386_v47, 0.0  ;;  %v603_v50 = vmul.f32 0.2, %v386_v47  ;;  %vm555_vm8 = vcmp.ge.f32.partialorder %v426_v48, 0.0 }
  0xb8   :  { %v698_v51 = vsel %vm570_vm5, %v464_v44, %v634_v46  ;;  %v619_v52 = vmul.f32 0.2, %v426_v48 }
  0xb9   :  { %v762_v53 = vpack.c.bf16 %v698_v51, %v698_v51  ;;  %v714_v54 = vsel %vm586_vm6, %v504_v45, %v650_v49  ;;  %v667_v55 = vsel %vm539_vm7, %v386_v47, %v603_v50 }
  0xba   :  { %v778_v56 = vpack.c.bf16 %v714_v54, %v714_v54  ;;  %v731_v57 = vpack.c.bf16 %v667_v55, %v667_v55  ;;  %v683_v58 = vsel %vm555_vm8, %v426_v48, %v619_v52 }
  0xbb   :  { %827 = vst.msk [vmem:[%s1496_s2 + $0x90] sm:$0xf] %vm790_vm3, %v762_v53  ;;  %v747_v59 = vpack.c.bf16 %v683_v58, %v683_v58 }
  0xbc   :  { %843 = vst.msk [vmem:[%s1496_s2 + $0xd0] sm:$0xf] %vm790_vm3, %v778_v56 }
  0xbd   :  { %796 = vst.msk [vmem:[%s1496_s2 + $0x14] sm:$0xf] %vm790_vm3, %v731_v57  ;;  %v466_v60 = vpop.f32.mrf.mxu2  ;;  %v506_v61 = vpop.f32.mrf.mxu3 }
  0xbe   :  { %812 = vst.msk [vmem:[%s1496_s2 + $0x54] sm:$0xf] %vm790_vm3, %v747_v59  ;;  %vm571_vm9 = vcmp.ge.f32.partialorder %v466_v60, 0.0  ;;  %v635_v62 = vmul.f32 0.2, %v466_v60  ;;  %vm587_vm10 = vcmp.ge.f32.partialorder %v506_v61, 0.0  ;;  %v389_v63 = vpop.f32.mrf.mxu0  ;;  %v429_v0 = vpop.f32.mrf.mxu1 }
  0xbf   :  { %v651_v1 = vmul.f32 0.2, %v506_v61  ;;  %vm540_vm11 = vcmp.ge.f32.partialorder %v389_v63, 0.0  ;;  %v604_v2 = vmul.f32 0.2, %v389_v63  ;;  %vm556_vm12 = vcmp.ge.f32.partialorder %v429_v0, 0.0 }
  0xc0   :  { %v699_v3 = vsel %vm571_vm9, %v466_v60, %v635_v62  ;;  %v620_v4 = vmul.f32 0.2, %v429_v0 }
  0xc1   :  { %v763_v5 = vpack.c.bf16 %v699_v3, %v699_v3  ;;  %v715_v6 = vsel %vm587_vm10, %v506_v61, %v651_v1  ;;  %v668_v7 = vsel %vm540_vm11, %v389_v63, %v604_v2 }
  0xc2   :  { %v779_v8 = vpack.c.bf16 %v715_v6, %v715_v6  ;;  %v732_v9 = vpack.c.bf16 %v668_v7, %v668_v7  ;;  %v684_v10 = vsel %vm556_vm12, %v429_v0, %v620_v4 }
  0xc3   :  { %828 = vst.msk [vmem:[%s1496_s2 + $0x94] sm:$0xf] %vm790_vm3, %v763_v5  ;;  %v748_v11 = vpack.c.bf16 %v684_v10, %v684_v10 }
  0xc4   :  { %844 = vst.msk [vmem:[%s1496_s2 + $0xd4] sm:$0xf] %vm790_vm3, %v779_v8 }
  0xc5   :  { %797 = vst.msk [vmem:[%s1496_s2 + $0x18] sm:$0xf] %vm790_vm3, %v732_v9  ;;  %v469_v12 = vpop.f32.mrf.mxu2  ;;  %v509_v13 = vpop.f32.mrf.mxu3 }
  0xc6   :  { %813 = vst.msk [vmem:[%s1496_s2 + $0x58] sm:$0xf] %vm790_vm3, %v748_v11  ;;  %vm572_vm13 = vcmp.ge.f32.partialorder %v469_v12, 0.0  ;;  %v636_v14 = vmul.f32 0.2, %v469_v12  ;;  %vm588_vm14 = vcmp.ge.f32.partialorder %v509_v13, 0.0  ;;  %v391_v15 = vpop.f32.mrf.mxu0  ;;  %v431_v16 = vpop.f32.mrf.mxu1 }
  0xc7   :  { %v652_v17 = vmul.f32 0.2, %v509_v13  ;;  %vm541_vm15 = vcmp.ge.f32.partialorder %v391_v15, 0.0  ;;  %v605_v18 = vmul.f32 0.2, %v391_v15  ;;  %vm557_vm0 = vcmp.ge.f32.partialorder %v431_v16, 0.0 }
  0xc8   :  { %v700_v19 = vsel %vm572_vm13, %v469_v12, %v636_v14  ;;  %v621_v20 = vmul.f32 0.2, %v431_v16 }
  0xc9   :  { %v764_v21 = vpack.c.bf16 %v700_v19, %v700_v19  ;;  %v716_v22 = vsel %vm588_vm14, %v509_v13, %v652_v17  ;;  %v669_v23 = vsel %vm541_vm15, %v391_v15, %v605_v18 }
  0xca   :  { %v780_v24 = vpack.c.bf16 %v716_v22, %v716_v22  ;;  %v733_v25 = vpack.c.bf16 %v669_v23, %v669_v23  ;;  %v685_v26 = vsel %vm557_vm0, %v431_v16, %v621_v20 }
  0xcb   :  { %829 = vst.msk [vmem:[%s1496_s2 + $0x98] sm:$0xf] %vm790_vm3, %v764_v21  ;;  %v749_v27 = vpack.c.bf16 %v685_v26, %v685_v26 }
  0xcc   :  { %845 = vst.msk [vmem:[%s1496_s2 + $0xd8] sm:$0xf] %vm790_vm3, %v780_v24 }
  0xcd   :  { %798 = vst.msk [vmem:[%s1496_s2 + $0x1c] sm:$0xf] %vm790_vm3, %v733_v25  ;;  %v471_v28 = vpop.f32.mrf.mxu2  ;;  %v511_v29 = vpop.f32.mrf.mxu3 }
  0xce   :  { %814 = vst.msk [vmem:[%s1496_s2 + $0x5c] sm:$0xf] %vm790_vm3, %v749_v27  ;;  %vm573_vm1 = vcmp.ge.f32.partialorder %v471_v28, 0.0  ;;  %v637_v30 = vmul.f32 0.2, %v471_v28  ;;  %vm589_vm2 = vcmp.ge.f32.partialorder %v511_v29, 0.0  ;;  %v394_v31 = vpop.f32.mrf.mxu0  ;;  %v434_v32 = vpop.f32.mrf.mxu1 }
  0xcf   :  { %v653_v33 = vmul.f32 0.2, %v511_v29  ;;  %vm542_vm4 = vcmp.ge.f32.partialorder %v394_v31, 0.0  ;;  %v606_v34 = vmul.f32 0.2, %v394_v31  ;;  %vm558_vm5 = vcmp.ge.f32.partialorder %v434_v32, 0.0 }
  0xd0   :  { %v701_v35 = vsel %vm573_vm1, %v471_v28, %v637_v30  ;;  %v622_v36 = vmul.f32 0.2, %v434_v32 }
  0xd1   :  { %v765_v37 = vpack.c.bf16 %v701_v35, %v701_v35  ;;  %v717_v38 = vsel %vm589_vm2, %v511_v29, %v653_v33  ;;  %v670_v39 = vsel %vm542_vm4, %v394_v31, %v606_v34 }
  0xd2   :  { %v781_v40 = vpack.c.bf16 %v717_v38, %v717_v38  ;;  %v734_v41 = vpack.c.bf16 %v670_v39, %v670_v39  ;;  %v686_v42 = vsel %vm558_vm5, %v434_v32, %v622_v36 }
  0xd3   :  { %830 = vst.msk [vmem:[%s1496_s2 + $0x9c] sm:$0xf] %vm790_vm3, %v765_v37  ;;  %v750_v43 = vpack.c.bf16 %v686_v42, %v686_v42 }
  0xd4   :  { %846 = vst.msk [vmem:[%s1496_s2 + $0xdc] sm:$0xf] %vm790_vm3, %v781_v40 }
  0xd5   :  { %799 = vst.msk [vmem:[%s1496_s2 + $0x20] sm:$0xf] %vm790_vm3, %v734_v41  ;;  %v474_v44 = vpop.f32.mrf.mxu2  ;;  %v514_v45 = vpop.f32.mrf.mxu3 }
  0xd6   :  { %815 = vst.msk [vmem:[%s1496_s2 + $0x60] sm:$0xf] %vm790_vm3, %v750_v43  ;;  %vm574_vm6 = vcmp.ge.f32.partialorder %v474_v44, 0.0  ;;  %v638_v46 = vmul.f32 0.2, %v474_v44  ;;  %vm590_vm7 = vcmp.ge.f32.partialorder %v514_v45, 0.0  ;;  %v396_v47 = vpop.f32.mrf.mxu0  ;;  %v436_v48 = vpop.f32.mrf.mxu1 }
  0xd7   :  { %v654_v49 = vmul.f32 0.2, %v514_v45  ;;  %vm543_vm8 = vcmp.ge.f32.partialorder %v396_v47, 0.0  ;;  %v607_v50 = vmul.f32 0.2, %v396_v47  ;;  %vm559_vm9 = vcmp.ge.f32.partialorder %v436_v48, 0.0 }
  0xd8   :  { %v702_v51 = vsel %vm574_vm6, %v474_v44, %v638_v46  ;;  %v623_v52 = vmul.f32 0.2, %v436_v48 }
  0xd9   :  { %v766_v53 = vpack.c.bf16 %v702_v51, %v702_v51  ;;  %v718_v54 = vsel %vm590_vm7, %v514_v45, %v654_v49  ;;  %v671_v55 = vsel %vm543_vm8, %v396_v47, %v607_v50 }
  0xda   :  { %v782_v56 = vpack.c.bf16 %v718_v54, %v718_v54  ;;  %v735_v57 = vpack.c.bf16 %v671_v55, %v671_v55  ;;  %v687_v58 = vsel %vm559_vm9, %v436_v48, %v623_v52 }
  0xdb   :  { %831 = vst.msk [vmem:[%s1496_s2 + $0xa0] sm:$0xf] %vm790_vm3, %v766_v53  ;;  %v751_v59 = vpack.c.bf16 %v687_v58, %v687_v58 }
  0xdc   :  { %847 = vst.msk [vmem:[%s1496_s2 + $0xe0] sm:$0xf] %vm790_vm3, %v782_v56 }
  0xdd   :  { %800 = vst.msk [vmem:[%s1496_s2 + $0x24] sm:$0xf] %vm790_vm3, %v735_v57  ;;  %v476_v60 = vpop.f32.mrf.mxu2  ;;  %v516_v61 = vpop.f32.mrf.mxu3 }
  0xde   :  { %816 = vst.msk [vmem:[%s1496_s2 + $0x64] sm:$0xf] %vm790_vm3, %v751_v59  ;;  %vm575_vm10 = vcmp.ge.f32.partialorder %v476_v60, 0.0  ;;  %v639_v62 = vmul.f32 0.2, %v476_v60  ;;  %vm591_vm11 = vcmp.ge.f32.partialorder %v516_v61, 0.0  ;;  %v399_v63 = vpop.f32.mrf.mxu0  ;;  %v439_v0 = vpop.f32.mrf.mxu1 }
  0xdf   :  { %v655_v1 = vmul.f32 0.2, %v516_v61  ;;  %vm544_vm12 = vcmp.ge.f32.partialorder %v399_v63, 0.0  ;;  %v608_v2 = vmul.f32 0.2, %v399_v63  ;;  %vm560_vm13 = vcmp.ge.f32.partialorder %v439_v0, 0.0 }
  0xe0   :  { %v703_v3 = vsel %vm575_vm10, %v476_v60, %v639_v62  ;;  %v624_v4 = vmul.f32 0.2, %v439_v0 }
  0xe1   :  { %v767_v5 = vpack.c.bf16 %v703_v3, %v703_v3  ;;  %v719_v6 = vsel %vm591_vm11, %v516_v61, %v655_v1  ;;  %v672_v7 = vsel %vm544_vm12, %v399_v63, %v608_v2 }
  0xe2   :  { %v783_v8 = vpack.c.bf16 %v719_v6, %v719_v6  ;;  %v736_v9 = vpack.c.bf16 %v672_v7, %v672_v7  ;;  %v688_v10 = vsel %vm560_vm13, %v439_v0, %v624_v4 }
  0xe3   :  { %832 = vst.msk [vmem:[%s1496_s2 + $0xa4] sm:$0xf] %vm790_vm3, %v767_v5  ;;  %v752_v11 = vpack.c.bf16 %v688_v10, %v688_v10 }
  0xe4   :  { %848 = vst.msk [vmem:[%s1496_s2 + $0xe4] sm:$0xf] %vm790_vm3, %v783_v8 }
  0xe5   :  { %801 = vst.msk [vmem:[%s1496_s2 + $0x28] sm:$0xf] %vm790_vm3, %v736_v9  ;;  %v479_v12 = vpop.f32.mrf.mxu2  ;;  %v519_v13 = vpop.f32.mrf.mxu3 }
  0xe6   :  { %817 = vst.msk [vmem:[%s1496_s2 + $0x68] sm:$0xf] %vm790_vm3, %v752_v11  ;;  %vm576_vm14 = vcmp.ge.f32.partialorder %v479_v12, 0.0  ;;  %v640_v14 = vmul.f32 0.2, %v479_v12  ;;  %vm592_vm15 = vcmp.ge.f32.partialorder %v519_v13, 0.0  ;;  %v401_v15 = vpop.f32.mrf.mxu0  ;;  %v441_v16 = vpop.f32.mrf.mxu1 }
  0xe7   :  { %v656_v17 = vmul.f32 0.2, %v519_v13  ;;  %vm545_vm0 = vcmp.ge.f32.partialorder %v401_v15, 0.0  ;;  %v609_v18 = vmul.f32 0.2, %v401_v15  ;;  %vm561_vm1 = vcmp.ge.f32.partialorder %v441_v16, 0.0 }
  0xe8   :  { %v704_v19 = vsel %vm576_vm14, %v479_v12, %v640_v14  ;;  %v625_v20 = vmul.f32 0.2, %v441_v16 }
  0xe9   :  { %v768_v21 = vpack.c.bf16 %v704_v19, %v704_v19  ;;  %v720_v22 = vsel %vm592_vm15, %v519_v13, %v656_v17  ;;  %v673_v23 = vsel %vm545_vm0, %v401_v15, %v609_v18 }
  0xea   :  { %v784_v24 = vpack.c.bf16 %v720_v22, %v720_v22  ;;  %v737_v25 = vpack.c.bf16 %v673_v23, %v673_v23  ;;  %v689_v26 = vsel %vm561_vm1, %v441_v16, %v625_v20 }
  0xeb   :  { %833 = vst.msk [vmem:[%s1496_s2 + $0xa8] sm:$0xf] %vm790_vm3, %v768_v21  ;;  %v753_v27 = vpack.c.bf16 %v689_v26, %v689_v26 }
  0xec   :  { %849 = vst.msk [vmem:[%s1496_s2 + $0xe8] sm:$0xf] %vm790_vm3, %v784_v24 }
  0xed   :  { %802 = vst.msk [vmem:[%s1496_s2 + $0x2c] sm:$0xf] %vm790_vm3, %v737_v25  ;;  %v481_v28 = vpop.f32.mrf.mxu2  ;;  %v521_v29 = vpop.f32.mrf.mxu3 }
  0xee   :  { %818 = vst.msk [vmem:[%s1496_s2 + $0x6c] sm:$0xf] %vm790_vm3, %v753_v27  ;;  %vm577_vm2 = vcmp.ge.f32.partialorder %v481_v28, 0.0  ;;  %v641_v30 = vmul.f32 0.2, %v481_v28  ;;  %vm593_vm4 = vcmp.ge.f32.partialorder %v521_v29, 0.0  ;;  %v404_v31 = vpop.f32.mrf.mxu0  ;;  %v444_v32 = vpop.f32.mrf.mxu1 }
  0xef   :  { %v657_v33 = vmul.f32 0.2, %v521_v29  ;;  %vm546_vm5 = vcmp.ge.f32.partialorder %v404_v31, 0.0  ;;  %v610_v34 = vmul.f32 0.2, %v404_v31  ;;  %vm562_vm6 = vcmp.ge.f32.partialorder %v444_v32, 0.0 }
  0xf0   :  { %v705_v35 = vsel %vm577_vm2, %v481_v28, %v641_v30  ;;  %v626_v36 = vmul.f32 0.2, %v444_v32 }
  0xf1   :  { %v769_v37 = vpack.c.bf16 %v705_v35, %v705_v35  ;;  %v721_v38 = vsel %vm593_vm4, %v521_v29, %v657_v33  ;;  %v674_v39 = vsel %vm546_vm5, %v404_v31, %v610_v34 }
  0xf2   :  { %v785_v40 = vpack.c.bf16 %v721_v38, %v721_v38  ;;  %v738_v41 = vpack.c.bf16 %v674_v39, %v674_v39  ;;  %v690_v42 = vsel %vm562_vm6, %v444_v32, %v626_v36 }
  0xf3   :  { %834 = vst.msk [vmem:[%s1496_s2 + $0xac] sm:$0xf] %vm790_vm3, %v769_v37  ;;  %v754_v43 = vpack.c.bf16 %v690_v42, %v690_v42 }
  0xf4   :  { %850 = vst.msk [vmem:[%s1496_s2 + $0xec] sm:$0xf] %vm790_vm3, %v785_v40 }
  0xf5   :  { %803 = vst.msk [vmem:[%s1496_s2 + $0x30] sm:$0xf] %vm790_vm3, %v738_v41  ;;  %v484_v44 = vpop.f32.mrf.mxu2  ;;  %v524_v45 = vpop.f32.mrf.mxu3 }
  0xf6   :  { %819 = vst.msk [vmem:[%s1496_s2 + $0x70] sm:$0xf] %vm790_vm3, %v754_v43  ;;  %vm578_vm7 = vcmp.ge.f32.partialorder %v484_v44, 0.0  ;;  %v642_v46 = vmul.f32 0.2, %v484_v44  ;;  %vm594_vm8 = vcmp.ge.f32.partialorder %v524_v45, 0.0  ;;  %v406_v47 = vpop.f32.mrf.mxu0  ;;  %v446_v48 = vpop.f32.mrf.mxu1 }
  0xf7   :  { %v658_v49 = vmul.f32 0.2, %v524_v45  ;;  %vm547_vm9 = vcmp.ge.f32.partialorder %v406_v47, 0.0  ;;  %v611_v50 = vmul.f32 0.2, %v406_v47  ;;  %vm563_vm10 = vcmp.ge.f32.partialorder %v446_v48, 0.0 }
  0xf8   :  { %v706_v51 = vsel %vm578_vm7, %v484_v44, %v642_v46  ;;  %v627_v52 = vmul.f32 0.2, %v446_v48 }
  0xf9   :  { %v770_v53 = vpack.c.bf16 %v706_v51, %v706_v51  ;;  %v722_v54 = vsel %vm594_vm8, %v524_v45, %v658_v49  ;;  %v675_v55 = vsel %vm547_vm9, %v406_v47, %v611_v50 }
  0xfa   :  { %v786_v56 = vpack.c.bf16 %v722_v54, %v722_v54  ;;  %v739_v57 = vpack.c.bf16 %v675_v55, %v675_v55  ;;  %v691_v58 = vsel %vm563_vm10, %v446_v48, %v627_v52 }
  0xfb   :  { %835 = vst.msk [vmem:[%s1496_s2 + $0xb0] sm:$0xf] %vm790_vm3, %v770_v53  ;;  %v755_v59 = vpack.c.bf16 %v691_v58, %v691_v58 }
  0xfc   :  { %851 = vst.msk [vmem:[%s1496_s2 + $0xf0] sm:$0xf] %vm790_vm3, %v786_v56 }
  0xfd   :  { %804 = vst.msk [vmem:[%s1496_s2 + $0x34] sm:$0xf] %vm790_vm3, %v739_v57  ;;  %v486_v60 = vpop.f32.mrf.mxu2  ;;  %v526_v61 = vpop.f32.mrf.mxu3 }
  0xfe   :  { %820 = vst.msk [vmem:[%s1496_s2 + $0x74] sm:$0xf] %vm790_vm3, %v755_v59  ;;  %vm579_vm11 = vcmp.ge.f32.partialorder %v486_v60, 0.0  ;;  %v643_v62 = vmul.f32 0.2, %v486_v60  ;;  %vm595_vm12 = vcmp.ge.f32.partialorder %v526_v61, 0.0  ;;  %v409_v63 = vpop.f32.mrf.mxu0  ;;  %v449_v0 = vpop.f32.mrf.mxu1 }
  0xff   :  { %v659_v1 = vmul.f32 0.2, %v526_v61  ;;  %vm548_vm13 = vcmp.ge.f32.partialorder %v409_v63, 0.0  ;;  %v612_v2 = vmul.f32 0.2, %v409_v63  ;;  %vm564_vm14 = vcmp.ge.f32.partialorder %v449_v0, 0.0 }
 0x100   :  { %v707_v3 = vsel %vm579_vm11, %v486_v60, %v643_v62  ;;  %v628_v4 = vmul.f32 0.2, %v449_v0 }
 0x101   :  { %v771_v5 = vpack.c.bf16 %v707_v3, %v707_v3  ;;  %v723_v6 = vsel %vm595_vm12, %v526_v61, %v659_v1  ;;  %v676_v7 = vsel %vm548_vm13, %v409_v63, %v612_v2 }
 0x102   :  { %v787_v8 = vpack.c.bf16 %v723_v6, %v723_v6  ;;  %v740_v9 = vpack.c.bf16 %v676_v7, %v676_v7  ;;  %v692_v10 = vsel %vm564_vm14, %v449_v0, %v628_v4 }
 0x103   :  { %836 = vst.msk [vmem:[%s1496_s2 + $0xb4] sm:$0xf] %vm790_vm3, %v771_v5  ;;  %v756_v11 = vpack.c.bf16 %v692_v10, %v692_v10 }
 0x104   :  { %852 = vst.msk [vmem:[%s1496_s2 + $0xf4] sm:$0xf] %vm790_vm3, %v787_v8 }
 0x105   :  { %805 = vst.msk [vmem:[%s1496_s2 + $0x38] sm:$0xf] %vm790_vm3, %v740_v9  ;;  %v489_v12 = vpop.f32.mrf.mxu2  ;;  %v529_v13 = vpop.f32.mrf.mxu3 }
 0x106   :  { %821 = vst.msk [vmem:[%s1496_s2 + $0x78] sm:$0xf] %vm790_vm3, %v756_v11  ;;  %vm580_vm15 = vcmp.ge.f32.partialorder %v489_v12, 0.0  ;;  %v644_v14 = vmul.f32 0.2, %v489_v12  ;;  %vm596_vm0 = vcmp.ge.f32.partialorder %v529_v13, 0.0  ;;  %v411_v15 = vpop.f32.mrf.mxu0  ;;  %v451_v16 = vpop.f32.mrf.mxu1 }
 0x107   :  { %v660_v17 = vmul.f32 0.2, %v529_v13  ;;  %vm549_vm1 = vcmp.ge.f32.partialorder %v411_v15, 0.0  ;;  %v613_v18 = vmul.f32 0.2, %v411_v15  ;;  %vm565_vm2 = vcmp.ge.f32.partialorder %v451_v16, 0.0 }
 0x108   :  { %v708_v19 = vsel %vm580_vm15, %v489_v12, %v644_v14  ;;  %v629_v20 = vmul.f32 0.2, %v451_v16 }
 0x109   :  { %v772_v21 = vpack.c.bf16 %v708_v19, %v708_v19  ;;  %v724_v22 = vsel %vm596_vm0, %v529_v13, %v660_v17  ;;  %v677_v23 = vsel %vm549_vm1, %v411_v15, %v613_v18 }
 0x10a   :  { %v788_v24 = vpack.c.bf16 %v724_v22, %v724_v22  ;;  %v741_v25 = vpack.c.bf16 %v677_v23, %v677_v23  ;;  %v693_v26 = vsel %vm565_vm2, %v451_v16, %v629_v20 }
 0x10b   :  { %837 = vst.msk [vmem:[%s1496_s2 + $0xb8] sm:$0xf] %vm790_vm3, %v772_v21  ;;  %v757_v27 = vpack.c.bf16 %v693_v26, %v693_v26 }
 0x10c   :  { %853 = vst.msk [vmem:[%s1496_s2 + $0xf8] sm:$0xf] %vm790_vm3, %v788_v24 }
 0x10d   :  { %806 = vst.msk [vmem:[%s1496_s2 + $0x3c] sm:$0xf] %vm790_vm3, %v741_v25  ;;  %v491_v28 = vpop.f32.mrf.mxu2  ;;  %v531_v29 = vpop.f32.mrf.mxu3 }
 0x10e   :  { %822 = vst.msk [vmem:[%s1496_s2 + $0x7c] sm:$0xf] %vm790_vm3, %v757_v27  ;;  %vm581_vm4 = vcmp.ge.f32.partialorder %v491_v28, 0.0  ;;  %v645_v30 = vmul.f32 0.2, %v491_v28  ;;  %vm597_vm5 = vcmp.ge.f32.partialorder %v531_v29, 0.0 }
 0x10f   :  { %v661_v31 = vmul.f32 0.2, %v531_v29 }
 0x110   :  { %v709_v32 = vsel %vm581_vm4, %v491_v28, %v645_v30 }
 0x111   :  { %v773_v33 = vpack.c.bf16 %v709_v32, %v709_v32  ;;  %v725_v34 = vsel %vm597_vm5, %v531_v29, %v661_v31 }
 0x112   :  { %v789_v35 = vpack.c.bf16 %v725_v34, %v725_v34 }
 0x113   :  { %838 = vst.msk [vmem:[%s1496_s2 + $0xbc] sm:$0xf] %vm790_vm3, %v773_v33 }
 0x114   :  { %854 = vst.msk [vmem:[%s1496_s2 + $0xfc] sm:$0xf] %vm790_vm3, %v789_v35 }

// kernel: discriminator_forward.6
= control target key start
LH: loop header
LB: loop body
LE: loop exit
PB: predicated region body
PF: predicated region fallthrough
CT: control target
= control target key end

     0   :  { %s586_s9 = smov 0   ;;  %s667_s0 = inlined_call_operand.vmem [shape: bf16[2,64,128], index: 0, kind: input, shape index: {}]   ;;  %s668_s1 = inlined_call_operand.vmem [shape: bf16[128,16], index: 1, kind: input, shape index: {}]   ;;  %s669_s2 = inlined_call_operand.vmem [shape: bf16[2,64,16], index: 2, kind: output, shape index: {}]  }
   0x1 LB: > { %s452_s10 = sadd.s32 4294967295, %s568_s9   ;;  %p456_p0 = scmp.ge.s32.totalorder %s568_s9, 1  ;;  %s568_s9 = sphi %s586_s9, %s12_s9  }
   0x2   : > { %p112_p1 = scmp.lt.s32.totalorder %s568_s9, 3 }
   0x4   : > { %p113_p2 = pnand %p456_p0, %p112_p1 }
   0x5   : > { %p134_p3 = scmp.lt.s32.totalorder (!%p113_p2), %s452_s10, 1 }
   0x6   : > { %116 = sbr.rel (%p113_p2) target bundleno = 276 (0x114), region = 28 }
   0xb   : > { %v524_v0 = vld [vmem:[%s668_s1 + $0x38] sm:$0xff]  ;;  %v523_v1 = vld [vmem:[%s668_s1 + $0x30] sm:$0xff]  ;;  %v522_v2 = vld [vmem:[%s668_s1 + $0x28] sm:$0xff]  ;;  %s671_s10 = smov (!%p134_p3, %s452_s10), 1  ;;  %vm269_vm0 = vcmask 130048   ;;  %v570_v17 = vmov 64.0  }
   0xc   : > { %240 = vmatpush.bf16.msra.mxu0 %v524_v0  ;;  %525 = vmatpush.bf16.msra.mxu1 %v524_v0  ;;  %v521_v3 = vld [vmem:[%s668_s1 + $0x20] sm:$0xff]  ;;  %v520_v4 = vld [vmem:[%s668_s1 + $0x18] sm:$0xff]  ;;  %v519_v5 = vld [vmem:[%s668_s1 + $0x10] sm:$0xff]  ;;  %s511_s25 = sshll.u32 %s671_s10, 5  ;;  %558 = vrcp.f32 %v570_v17  ;;  %vm388_vm5 = vcmask 125952  }
   0xd   : > { %526 = vmatpush.bf16.msra.mxu2 %v524_v0  ;;  %527 = vmatpush.bf16.msra.mxu3 %v524_v0  ;;  %v518_v6 = vld [vmem:[%s668_s1 + $0x8] sm:$0xff]  ;;  %v517_v7 = vld [vmem:[%s668_s1] sm:$0xff]  ;;  %s138_s30 = scalar_lea.vmem %s667_s0, %s511_s25  ;;  %s143_s5 = scalar_lea.vmem %s669_s2, %s511_s25 }
   0xe   : > { %v513_v8 = vld [vmem:[%s138_s30] sm:$0xff]  ;;  %v514_v9 = vld [vmem:[%s138_s30 + $0x8] sm:$0xff]  ;;  %v515_v10 = vld [vmem:[%s138_s30 + $0x10] sm:$0xff] }
   0xf   : > { %v516_v11 = vld [vmem:[%s138_s30 + $0x18] sm:$0xff] }
  0x10   : > { %241 = vmatpush.bf16.msra.mxu0 %v523_v1  ;;  %528 = vmatpush.bf16.msra.mxu1 %v523_v1 }
  0x11   : > { %529 = vmatpush.bf16.msra.mxu2 %v523_v1  ;;  %530 = vmatpush.bf16.msra.mxu3 %v523_v1 }
  0x12   : > { %v559_v25 = vpop.eup %558 }
  0x13   : > { %v292_v31 = vmul.f32 64.0, %v559_v25  ;;  %vm296_vm1 = vweird.f32 %v559_v25 }
  0x14   : > { %242 = vmatpush.bf16.msra.mxu0 %v522_v2  ;;  %531 = vmatpush.bf16.msra.mxu1 %v522_v2 }
  0x15   : > { %532 = vmatpush.bf16.msra.mxu2 %v522_v2  ;;  %533 = vmatpush.bf16.msra.mxu3 %v522_v2  ;;  %v293_v37 = vsub.f32 1.0, %v292_v31 }
  0x17   : > { %v294_v40 = vmul.f32 %v559_v25, %v293_v37 }
  0x18   : > { %243 = vmatpush.bf16.msra.mxu0 %v521_v3  ;;  %534 = vmatpush.bf16.msra.mxu1 %v521_v3 }
  0x19   : > { %535 = vmatpush.bf16.msra.mxu2 %v521_v3  ;;  %536 = vmatpush.bf16.msra.mxu3 %v521_v3  ;;  %v295_v43 = vadd.f32 %v559_v25, %v294_v40 }
  0x1b   : > { %v297_v46 = vsel %vm296_vm1, %v559_v25, %v295_v43 }
  0x1c   : > { %244 = vmatpush.bf16.msra.mxu0 %v520_v4  ;;  %537 = vmatpush.bf16.msra.mxu1 %v520_v4 }
  0x1d   : > { %538 = vmatpush.bf16.msra.mxu2 %v520_v4  ;;  %539 = vmatpush.bf16.msra.mxu3 %v520_v4 }
  0x20   : > { %245 = vmatpush.bf16.msra.mxu0 %v519_v5  ;;  %540 = vmatpush.bf16.msra.mxu1 %v519_v5 }
  0x21   : > { %541 = vmatpush.bf16.msra.mxu2 %v519_v5  ;;  %542 = vmatpush.bf16.msra.mxu3 %v519_v5 }
  0x24   : > { %246 = vmatpush.bf16.msra.mxu0 %v518_v6  ;;  %543 = vmatpush.bf16.msra.mxu1 %v518_v6 }
  0x25   : > { %544 = vmatpush.bf16.msra.mxu2 %v518_v6  ;;  %545 = vmatpush.bf16.msra.mxu3 %v518_v6 }
  0x28   : > { %247 = vmatpush.bf16.msra.mxu0 %v517_v7  ;;  %546 = vmatpush.bf16.msra.mxu1 %v517_v7 }
  0x29   : > { %547 = vmatpush.bf16.msra.mxu2 %v517_v7  ;;  %548 = vmatpush.bf16.msra.mxu3 %v517_v7 }
  0x2b   : > { %248 = vmatmul.bf16.vlgmr.msra.gmra.mxu0 %v513_v8  ;;  %253 = vmatmul.bf16.vlgmr.msra.gmra.mxu1 %v514_v9 }
  0x2c   : > { %258 = vmatmul.bf16.vlgmr.msra.gmra.mxu2 %v515_v10  ;;  %263 = vmatmul.bf16.vlgmr.msra.gmra.mxu3 %v516_v11 }
  0xa8   : > { %v249_v12 = vpop.f32.mrf.mxu0  ;;  %v254_v13 = vpop.f32.mrf.mxu1 }
  0xa9   : > { %v270_v18 = vsel %vm269_vm0, %v249_v12, 0.0  ;;  %v273_v22 = vsel %vm269_vm0, %v254_v13, 0.0 }
  0xaf   : > { %v259_v14 = vpop.f32.mrf.mxu2  ;;  %v264_v15 = vpop.f32.mrf.mxu3 }
  0xb0   : > { %v251_v16 = vpop.f32.mrf.mxu0  ;;  %v256_v21 = vpop.f32.mrf.mxu1  ;;  %v277_v27 = vsel %vm269_vm0, %v259_v14, 0.0  ;;  %v281_v34 = vsel %vm269_vm0, %v264_v15, 0.0 }
  0xb1   : > { %v271_v19 = vsel %vm269_vm0, %v251_v16, 0.0  ;;  %v275_v24 = vsel %vm269_vm0, %v256_v21, 0.0 }
  0xb2   : > { %v272_v20 = vadd.f32 %v271_v19, %v270_v18 }
  0xb4   : > { %v274_v23 = vadd.f32 %v273_v22, %v272_v20 }
  0xb6   : > { %v276_v26 = vadd.f32 %v275_v24, %v274_v23 }
  0xb7   : > { %v261_v28 = vpop.f32.mrf.mxu2  ;;  %v266_v33 = vpop.f32.mrf.mxu3 }
  0xb8   : > { %v278_v29 = vadd.f32 %v277_v27, %v276_v26  ;;  %v279_v30 = vsel %vm269_vm0, %v261_v28, 0.0  ;;  %v283_v36 = vsel %vm269_vm0, %v266_v33, 0.0 }
  0xba   : > { %v280_v32 = vadd.f32 %v279_v30, %v278_v29 }
  0xbc   : > { %v282_v35 = vadd.f32 %v281_v34, %v280_v32 }
  0xbe   : > { %v284_v38 = vadd.f32 %v283_v36, %v282_v35 }
  0xc0   : > { %v285_v39 = vrot.slane %v284_v38, 4 }
  0xc2   : > { %v286_v41 = vadd.f32 %v285_v39, %v284_v38 }
  0xc4   : > { %v287_v42 = vrot.slane %v286_v41, 2 }
  0xc6   : > { %v288_v44 = vadd.f32 %v287_v42, %v286_v41 }
  0xc8   : > { %v289_v45 = vrot.slane %v288_v44, 1 }
  0xca   : > { %v290_v47 = vadd.f32 %v289_v45, %v288_v44 }
  0xcc   : > { %v298_v48 = vmul.f32 %v297_v46, %v290_v47 }
  0xce   : > { %v299_v49 = vsub.f32 %v249_v12, %v298_v48  ;;  %v300_v50 = vsub.f32 %v251_v16, %v298_v48  ;;  %v301_v51 = vsub.f32 %v254_v13, %v298_v48  ;;  %v302_v52 = vsub.f32 %v256_v21, %v298_v48 }
  0xcf   : > { %v303_v53 = vsub.f32 %v259_v14, %v298_v48  ;;  %v304_v57 = vsub.f32 %v261_v28, %v298_v48  ;;  %v305_v62 = vsub.f32 %v264_v15, %v298_v48  ;;  %v306_v2 = vsub.f32 %v266_v33, %v298_v48 }
  0xd0   : > { %v307_v54 = vmul.f32 %v299_v49, %v299_v49  ;;  %v308_v55 = vmul.f32 %v300_v50, %v300_v50  ;;  %v309_v56 = vmul.f32 %v301_v51, %v301_v51  ;;  %v310_v58 = vmul.f32 %v302_v52, %v302_v52 }
  0xd1   : > { %v311_v63 = vmul.f32 %v303_v53, %v303_v53  ;;  %v312_v3 = vmul.f32 %v304_v57, %v304_v57  ;;  %v313_v6 = vmul.f32 %v305_v62, %v305_v62  ;;  %v314_v9 = vmul.f32 %v306_v2, %v306_v2 }
  0xd2   : > { %v315_v59 = vsel %vm269_vm0, %v307_v54, 0.0  ;;  %v316_v60 = vsel %vm269_vm0, %v308_v55, 0.0  ;;  %v318_v0 = vsel %vm269_vm0, %v309_v56, 0.0  ;;  %v320_v4 = vsel %vm269_vm0, %v310_v58, 0.0 }
  0xd3   : > { %v317_v61 = vadd.f32 %v316_v60, %v315_v59  ;;  %v322_v7 = vsel %vm269_vm0, %v311_v63, 0.0  ;;  %v324_v10 = vsel %vm269_vm0, %v312_v3, 0.0  ;;  %v326_v12 = vsel %vm269_vm0, %v313_v6, 0.0 }
  0xd4   : > { %v328_v14 = vsel %vm269_vm0, %v314_v9, 0.0 }
  0xd5   : > { %v319_v1 = vadd.f32 %v318_v0, %v317_v61 }
  0xd7   : > { %v321_v5 = vadd.f32 %v320_v4, %v319_v1 }
  0xd9   : > { %v323_v8 = vadd.f32 %v322_v7, %v321_v5 }
  0xdb   : > { %v325_v11 = vadd.f32 %v324_v10, %v323_v8 }
  0xdd   : > { %v327_v13 = vadd.f32 %v326_v12, %v325_v11 }
  0xdf   : > { %v329_v15 = vadd.f32 %v328_v14, %v327_v13 }
  0xe1   : > { %v330_v16 = vrot.slane %v329_v15, 4 }
  0xe3   : > { %v331_v17 = vadd.f32 %v330_v16, %v329_v15 }
  0xe5   : > { %v332_v18 = vrot.slane %v331_v17, 2 }
  0xe7   : > { %v333_v19 = vadd.f32 %v332_v18, %v331_v17 }
  0xe9   : > { %v334_v20 = vrot.slane %v333_v19, 1 }
  0xeb   : > { %v335_v21 = vadd.f32 %v334_v20, %v333_v19 }
  0xed   : > { %v336_v22 = vmul.f32 %v335_v21, %v297_v46 }
  0xef   : > { %v337_v23 = vadd.f32 1e-05, %v336_v22 }
  0xf1   : > { %560 = vrsqrt.f32 %v337_v23  ;;  %vm344_vm3 = vweird.f32 %v337_v23 }
  0xf7   : > { %v561_v24 = vpop.eup %560 }
  0xf8   : > { %v339_v25 = vmul.f32 %v561_v24, %v337_v23  ;;  %vm345_vm2 = vweird.f32 %v561_v24 }
  0xf9   : > { %vm346_vm4 = vmor %vm344_vm3, %vm345_vm2 }
  0xfa   : > { %v340_v26 = vmul.f32 %v561_v24, %v339_v25 }
  0xfc   : > { %v341_v27 = vmul.f32 0.5, %v340_v26 }
  0xfe   : > { %v342_v28 = vsub.f32 1.5, %v341_v27 }
 0x100   : > { %v343_v29 = vmul.f32 %v561_v24, %v342_v28 }
 0x102   : > { %v347_v30 = vsel %vm346_vm4, %v561_v24, %v343_v29 }
 0x103   : > { %v348_v31 = vmul.f32 %v347_v30, %v299_v49  ;;  %v349_v32 = vmul.f32 %v347_v30, %v300_v50  ;;  %v350_v33 = vmul.f32 %v347_v30, %v301_v51  ;;  %v351_v34 = vmul.f32 %v347_v30, %v302_v52 }
 0x104   : > { %v352_v35 = vmul.f32 %v347_v30, %v303_v53  ;;  %v353_v36 = vmul.f32 %v347_v30, %v304_v57  ;;  %v354_v37 = vmul.f32 %v347_v30, %v305_v62  ;;  %v355_v38 = vmul.f32 %v347_v30, %v306_v2 }
 0x105   : > { %vm356_vm6 = vcmp.ge.f32.partialorder %v348_v31, 0.0  ;;  %vm357_vm7 = vcmp.ge.f32.partialorder %v349_v32, 0.0  ;;  %vm358_vm8 = vcmp.ge.f32.partialorder %v350_v33, 0.0  ;;  %vm359_vm9 = vcmp.ge.f32.partialorder %v351_v34, 0.0 }
 0x106   : > { %vm360_vm10 = vcmp.ge.f32.partialorder %v352_v35, 0.0  ;;  %vm361_vm11 = vcmp.ge.f32.partialorder %v353_v36, 0.0  ;;  %vm362_vm12 = vcmp.ge.f32.partialorder %v354_v37, 0.0  ;;  %v364_v39 = vmul.f32 0.2, %v348_v31 }
 0x107   : > { %v365_v40 = vmul.f32 0.2, %v349_v32  ;;  %v366_v41 = vmul.f32 0.2, %v350_v33  ;;  %v367_v42 = vmul.f32 0.2, %v351_v34 }
 0x108   : > { %v368_v43 = vmul.f32 0.2, %v352_v35  ;;  %v369_v44 = vmul.f32 0.2, %v353_v36  ;;  %v370_v45 = vmul.f32 0.2, %v354_v37  ;;  %v372_v47 = vsel %vm356_vm6, %v348_v31, %v364_v39 }
 0x109   : > { %v371_v46 = vmul.f32 0.2, %v355_v38  ;;  %v373_v48 = vsel %vm357_vm7, %v349_v32, %v365_v40  ;;  %vm363_vm13 = vcmp.ge.f32.partialorder %v355_v38, 0.0  ;;  %v374_v49 = vsel %vm358_vm8, %v350_v33, %v366_v41 }
 0x10a   : > { %v375_v50 = vsel %vm359_vm9, %v351_v34, %v367_v42  ;;  %v376_v51 = vsel %vm360_vm10, %v352_v35, %v368_v43  ;;  %v377_v52 = vsel %vm361_vm11, %v353_v36, %v369_v44  ;;  %v380_v53 = vpack.c.bf16 %v372_v47, %v372_v47 }
 0x10b   : > { %v381_v54 = vpack.c.bf16 %v373_v48, %v373_v48  ;;  %v378_v55 = vsel %vm362_vm12, %v354_v37, %v370_v45  ;;  %v382_v56 = vpack.c.bf16 %v374_v49, %v374_v49  ;;  %v383_v57 = vpack.c.bf16 %v375_v50, %v375_v50 }
 0x10c   : > { %v379_v58 = vsel %vm363_vm13, %v355_v38, %v371_v46  ;;  %v384_v59 = vpack.c.bf16 %v376_v51, %v376_v51  ;;  %389 = vst.msk [vmem:[%s143_s5] sm:$0xf] %vm388_vm5, %v380_v53  ;;  %v385_v60 = vpack.c.bf16 %v377_v52, %v377_v52  ;;  %v386_v61 = vpack.c.bf16 %v378_v55, %v378_v55 }
 0x10d   : > { %390 = vst.msk [vmem:[%s143_s5 + $0x4] sm:$0xf] %vm388_vm5, %v381_v54  ;;  %v387_v62 = vpack.c.bf16 %v379_v58, %v379_v58 }
 0x10e   : > { %391 = vst.msk [vmem:[%s143_s5 + $0x8] sm:$0xf] %vm388_vm5, %v382_v56 }
 0x10f   : > { %392 = vst.msk [vmem:[%s143_s5 + $0xc] sm:$0xf] %vm388_vm5, %v383_v57 }
 0x110   : > { %393 = vst.msk [vmem:[%s143_s5 + $0x10] sm:$0xf] %vm388_vm5, %v384_v59 }
 0x111   : > { %394 = vst.msk [vmem:[%s143_s5 + $0x14] sm:$0xf] %vm388_vm5, %v385_v60 }
 0x112   : > { %395 = vst.msk [vmem:[%s143_s5 + $0x18] sm:$0xf] %vm388_vm5, %v386_v61 }
 0x113   : > { %396 = vst.msk [vmem:[%s143_s5 + $0x1c] sm:$0xf] %vm388_vm5, %v387_v62 }
 0x114 PF: > { %s12_s9 = sadd.s32 1, %s568_s9  }
 0x115   : > { %p9_p4 = scmp.ge.s32.totalorder %s12_s9, 4  }
 0x117   :  { %11 = sbr.rel (!%p9_p4) target bundleno = 1 (0x1), region = 58 }

// kernel: discriminator_forward.7
= control target key start
LH: loop header
LB: loop body
LE: loop exit
PB: predicated region body
PF: predicated region fallthrough
CT: control target
= control target key end

     0   :  { %s563_s9 = smov 0   ;;  %s636_s0 = inlined_call_operand.vmem [shape: bf16[2,16,256], index: 0, kind: input, shape index: {}]   ;;  %s637_s1 = inlined_call_operand.vmem [shape: bf16[256,32], index: 1, kind: input, shape index: {}]   ;;  %s638_s2 = inlined_call_operand.vmem [shape: bf16[2,16,32], index: 2, kind: output, shape index: {}]  }
   0x1 LB: > { %s423_s10 = sadd.s32 4294967295, %s545_s9   ;;  %p427_p0 = scmp.ge.s32.totalorder %s545_s9, 1  ;;  %s545_s9 = sphi %s563_s9, %s12_s9  }
   0x2   : > { %p112_p1 = scmp.lt.s32.totalorder %s545_s9, 3 }
   0x4   : > { %p113_p2 = pnand %p427_p0, %p112_p1 }
   0x5   : > { %p134_p3 = scmp.lt.s32.totalorder (!%p113_p2), %s423_s10, 1 }
   0x6   : > { %116 = sbr.rel (%p113_p2) target bundleno = 247 (0xf7), region = 28 }
   0xb   : > { %v517_v0 = vld [vmem:[%s637_s1 + $0x38] sm:$0xff]  ;;  %v516_v2 = vld [vmem:[%s637_s1 + $0x30] sm:$0xff]  ;;  %v515_v4 = vld [vmem:[%s637_s1 + $0x28] sm:$0xff]  ;;  %s640_s10 = smov (!%p134_p3, %s423_s10), 1  ;;  %v547_v22 = vmov 16.0   ;;  %vm312_vm0 = vcmask 261120  }
   0xc   : > { %v525_v1 = vld [vmem:[%s637_s1 + $0x78] sm:$0xff]  ;;  %284 = vmatpush.bf16.msra.mxu0 %v517_v0  ;;  %v524_v3 = vld [vmem:[%s637_s1 + $0x70] sm:$0xff]  ;;  %v523_v5 = vld [vmem:[%s637_s1 + $0x68] sm:$0xff]  ;;  %s506_s7 = sshll.u32 %s640_s10, 4  ;;  %535 = vrcp.f32 %v547_v22  ;;  %s507_s21 = sshll.u32 %s640_s10, 3  ;;  %vm365_vm7 = vcmask 257024  }
   0xd   : > { %298 = vmatpush.bf16.msra.mxu1 %v525_v1  ;;  %v514_v6 = vld [vmem:[%s637_s1 + $0x20] sm:$0xff]  ;;  %v513_v8 = vld [vmem:[%s637_s1 + $0x18] sm:$0xff]  ;;  %v512_v10 = vld [vmem:[%s637_s1 + $0x10] sm:$0xff]  ;;  %s138_s16 = scalar_lea.vmem %s636_s0, %s506_s7  ;;  %s143_s24 = scalar_lea.vmem %s638_s2, %s507_s21 }
   0xe   : > { %v522_v7 = vld [vmem:[%s637_s1 + $0x60] sm:$0xff]  ;;  %v521_v9 = vld [vmem:[%s637_s1 + $0x58] sm:$0xff]  ;;  %v520_v11 = vld [vmem:[%s637_s1 + $0x50] sm:$0xff] }
   0xf   : > { %v511_v12 = vld [vmem:[%s637_s1 + $0x8] sm:$0xff]  ;;  %v510_v14 = vld [vmem:[%s637_s1] sm:$0xff] }
  0x10   : > { %285 = vmatpush.bf16.msra.mxu0 %v516_v2  ;;  %v519_v13 = vld [vmem:[%s637_s1 + $0x48] sm:$0xff]  ;;  %v518_v15 = vld [vmem:[%s637_s1 + $0x40] sm:$0xff] }
  0x11   : > { %299 = vmatpush.bf16.msra.mxu1 %v524_v3  ;;  %v434_v16 = vld [vmem:[%s138_s16] sm:$0xf]  ;;  %v509_v17 = vld [vmem:[%s138_s16 + $0x4] sm:$0xf0]  ;;  %v508_v18 = vld [vmem:[%s138_s16 + $0x4] sm:$0xf] }
  0x12   : > { %v436_v19 = vld [vmem:[%s138_s16 + $0x8] sm:$0xf0]  ;;  %v435_v20 = vor.u32 %v509_v17, %v434_v16  ;;  %v536_v25 = vpop.eup %535 }
  0x13   : > { %v439_v21 = vor.u32 %v508_v18, %v436_v19  ;;  %v323_v27 = vmul.f32 16.0, %v536_v25  ;;  %vm327_vm1 = vweird.f32 %v536_v25 }
  0x14   : > { %286 = vmatpush.bf16.msra.mxu0 %v515_v4 }
  0x15   : > { %300 = vmatpush.bf16.msra.mxu1 %v523_v5  ;;  %v324_v33 = vsub.f32 1.0, %v323_v27 }
  0x17   : > { %v325_v36 = vmul.f32 %v536_v25, %v324_v33 }
  0x18   : > { %287 = vmatpush.bf16.msra.mxu0 %v514_v6 }
  0x19   : > { %301 = vmatpush.bf16.msra.mxu1 %v522_v7  ;;  %v326_v39 = vadd.f32 %v536_v25, %v325_v36 }
  0x1b   : > { %v328_v42 = vsel %vm327_vm1, %v536_v25, %v326_v39 }
  0x1c   : > { %288 = vmatpush.bf16.msra.mxu0 %v513_v8 }
  0x1d   : > { %302 = vmatpush.bf16.msra.mxu1 %v521_v9 }
  0x20   : > { %289 = vmatpush.bf16.msra.mxu0 %v512_v10 }
  0x21   : > { %303 = vmatpush.bf16.msra.mxu1 %v520_v11 }
  0x24   : > { %290 = vmatpush.bf16.msra.mxu0 %v511_v12 }
  0x25   : > { %304 = vmatpush.bf16.msra.mxu1 %v519_v13 }
  0x28   : > { %291 = vmatpush.bf16.msra.mxu0 %v510_v14 }
  0x29   : > { %305 = vmatpush.bf16.msra.mxu1 %v518_v15 }
  0x2b   : > { %292 = vmatmul.bf16.vlgmr.msra.gmra.mxu0 %v435_v20 }
  0x2c   : > { %306 = vmatmul.bf16.vlgmr.msra.gmra.mxu1 %v439_v21 }
  0xa8   : > { %v293_v23 = vpop.f32.mrf.mxu0 }
  0xa9   : > { %v307_v24 = vpop.f32.mrf.mxu1 }
  0xaa   : > { %v308_v26 = vadd.f32 %v307_v24, %v293_v23 }
  0xac   : > { %v313_v31 = vsel %vm312_vm0, %v308_v26, 0.0 }
  0xb0   : > { %v295_v28 = vpop.f32.mrf.mxu0 }
  0xb1   : > { %v309_v29 = vpop.f32.mrf.mxu1 }
  0xb2   : > { %v310_v30 = vadd.f32 %v309_v29, %v295_v28 }
  0xb4   : > { %v314_v32 = vsel %vm312_vm0, %v310_v30, 0.0 }
  0xb5   : > { %v315_v34 = vadd.f32 %v314_v32, %v313_v31 }
  0xb7   : > { %v316_v35 = vrot.slane %v315_v34, 4 }
  0xb9   : > { %v317_v37 = vadd.f32 %v316_v35, %v315_v34 }
  0xbb   : > { %v318_v38 = vrot.slane %v317_v37, 2 }
  0xbd   : > { %v319_v40 = vadd.f32 %v318_v38, %v317_v37 }
  0xbf   : > { %v320_v41 = vrot.slane %v319_v40, 1 }
  0xc1   : > { %v321_v43 = vadd.f32 %v320_v41, %v319_v40 }
  0xc3   : > { %v329_v44 = vmul.f32 %v328_v42, %v321_v43 }
  0xc5   : > { %v330_v45 = vsub.f32 %v308_v26, %v329_v44  ;;  %v331_v46 = vsub.f32 %v310_v30, %v329_v44 }
  0xc7   : > { %v332_v47 = vmul.f32 %v330_v45, %v330_v45  ;;  %v333_v48 = vmul.f32 %v331_v46, %v331_v46 }
  0xc9   : > { %v334_v49 = vsel %vm312_vm0, %v332_v47, 0.0  ;;  %v335_v50 = vsel %vm312_vm0, %v333_v48, 0.0 }
  0xca   : > { %v336_v51 = vadd.f32 %v335_v50, %v334_v49 }
  0xcc   : > { %v337_v52 = vrot.slane %v336_v51, 4 }
  0xce   : > { %v338_v53 = vadd.f32 %v337_v52, %v336_v51 }
  0xd0   : > { %v339_v54 = vrot.slane %v338_v53, 2 }
  0xd2   : > { %v340_v55 = vadd.f32 %v339_v54, %v338_v53 }
  0xd4   : > { %v341_v56 = vrot.slane %v340_v55, 1 }
  0xd6   : > { %v342_v57 = vadd.f32 %v341_v56, %v340_v55 }
  0xd8   : > { %v343_v58 = vmul.f32 %v342_v57, %v328_v42 }
  0xda   : > { %v344_v59 = vadd.f32 1e-05, %v343_v58 }
  0xdc   : > { %537 = vrsqrt.f32 %v344_v59  ;;  %vm351_vm3 = vweird.f32 %v344_v59 }
  0xe2   : > { %v538_v60 = vpop.eup %537 }
  0xe3   : > { %v346_v61 = vmul.f32 %v538_v60, %v344_v59  ;;  %vm352_vm2 = vweird.f32 %v538_v60 }
  0xe4   : > { %vm353_vm4 = vmor %vm351_vm3, %vm352_vm2 }
  0xe5   : > { %v347_v62 = vmul.f32 %v538_v60, %v346_v61 }
  0xe7   : > { %v348_v63 = vmul.f32 0.5, %v347_v62 }
  0xe9   : > { %v349_v0 = vsub.f32 1.5, %v348_v63 }
  0xeb   : > { %v350_v1 = vmul.f32 %v538_v60, %v349_v0 }
  0xed   : > { %v354_v2 = vsel %vm353_vm4, %v538_v60, %v350_v1 }
  0xee   : > { %v355_v3 = vmul.f32 %v354_v2, %v330_v45  ;;  %v356_v4 = vmul.f32 %v354_v2, %v331_v46 }
  0xf0   : > { %vm357_vm5 = vcmp.ge.f32.partialorder %v355_v3, 0.0  ;;  %vm358_vm6 = vcmp.ge.f32.partialorder %v356_v4, 0.0  ;;  %v359_v5 = vmul.f32 0.2, %v355_v3  ;;  %v360_v6 = vmul.f32 0.2, %v356_v4 }
  0xf2   : > { %v361_v7 = vsel %vm357_vm5, %v355_v3, %v359_v5  ;;  %v362_v8 = vsel %vm358_vm6, %v356_v4, %v360_v6 }
  0xf3   : > { %v363_v9 = vpack.c.bf16 %v361_v7, %v361_v7  ;;  %v364_v10 = vpack.c.bf16 %v362_v8, %v362_v8 }
  0xf5   : > { %366 = vst.msk [vmem:[%s143_s24] sm:$0xf] %vm365_vm7, %v363_v9 }
  0xf6   : > { %367 = vst.msk [vmem:[%s143_s24 + $0x4] sm:$0xf] %vm365_vm7, %v364_v10 }
  0xf7 PF: > { %s12_s9 = sadd.s32 1, %s545_s9  }
  0xf8   : > { %p9_p4 = scmp.ge.s32.totalorder %s12_s9, 4  }
  0xfa   :  { %11 = sbr.rel (!%p9_p4) target bundleno = 1 (0x1), region = 58 }

// kernel: discriminator_forward.8
= control target key start
LH: loop header
LB: loop body
LE: loop exit
PB: predicated region body
PF: predicated region fallthrough
CT: control target
= control target key end

     0   :  { %s827_s9 = smov 0   ;;  %s953_s0 = inlined_call_operand.vmem [shape: bf16[2,9,512], index: 0, kind: input, shape index: {}]   ;;  %s954_s1 = inlined_call_operand.vmem [shape: bf16[512,64], index: 1, kind: input, shape index: {}]   ;;  %s955_s2 = inlined_call_operand.vmem [shape: bf16[2,9,64], index: 2, kind: output, shape index: {}]  }
   0x1 LB: > { %s597_s10 = sadd.s32 4294967295, %s809_s9   ;;  %p601_p0 = scmp.ge.s32.totalorder %s809_s9, 1  ;;  %s809_s9 = sphi %s827_s9, %s12_s9  }
   0x2   : > { %p112_p1 = scmp.lt.s32.totalorder %s809_s9, 3 }
   0x4   : > { %p113_p2 = pnand %p601_p0, %p112_p1 }
   0x5   : > { %p134_p3 = scmp.lt.s32.totalorder (!%p113_p2), %s597_s10, 1 }
   0x6   : > { %116 = sbr.rel (%p113_p2) target bundleno = 256 (0x100), region = 28 }
   0xb   : > { %v765_v0 = vld [vmem:[%s954_s1 + $0x38] sm:$0xff]  ;;  %v764_v4 = vld [vmem:[%s954_s1 + $0x30] sm:$0xff]  ;;  %v763_v8 = vld [vmem:[%s954_s1 + $0x28] sm:$0xff]  ;;  %s957_s10 = smov (!%p134_p3, %s597_s10), 1  ;;  %v811_v48 = vmov 9.0   ;;  %vm480_vm0 = vcmask 523264  }
   0xc   : > { %v773_v1 = vld [vmem:[%s954_s1 + $0x78] sm:$0xff]  ;;  %424 = vmatpush.bf16.msra.mxu0 %v765_v0  ;;  %v772_v5 = vld [vmem:[%s954_s1 + $0x70] sm:$0xff]  ;;  %v771_v9 = vld [vmem:[%s954_s1 + $0x68] sm:$0xff]  ;;  %s752_s5 = sshll.u32 %s957_s10, 5  ;;  %799 = vrcp.f32 %v811_v48  ;;  %vm482_vm1 = vcmask 516096   ;;  %s753_s27 = sshll.u32 %s957_s10, 3 }
   0xd   : > { %v781_v2 = vld [vmem:[%s954_s1 + $0xb8] sm:$0xff]  ;;  %438 = vmatpush.bf16.msra.mxu1 %v773_v1  ;;  %v780_v6 = vld [vmem:[%s954_s1 + $0xb0] sm:$0xff]  ;;  %v779_v10 = vld [vmem:[%s954_s1 + $0xa8] sm:$0xff]  ;;  %s138_s14 = scalar_lea.vmem %s953_s0, %s752_s5  ;;  %s143_s30 = scalar_lea.vmem %s955_s2, %s753_s27  ;;  %vm537_vm6 = vsmask.f32 256  ;;  %vm534_vm9 = vcmask 519168  }
   0xe   : > { %v789_v3 = vld [vmem:[%s954_s1 + $0xf8] sm:$0xff]  ;;  %452 = vmatpush.bf16.msra.mxu2 %v781_v2  ;;  %v788_v7 = vld [vmem:[%s954_s1 + $0xf0] sm:$0xff]  ;;  %v787_v11 = vld [vmem:[%s954_s1 + $0xe8] sm:$0xff] }
   0xf   : > { %466 = vmatpush.bf16.msra.mxu3 %v789_v3  ;;  %v762_v12 = vld [vmem:[%s954_s1 + $0x20] sm:$0xff]  ;;  %v761_v16 = vld [vmem:[%s954_s1 + $0x18] sm:$0xff]  ;;  %v760_v20 = vld [vmem:[%s954_s1 + $0x10] sm:$0xff] }
  0x10   : > { %425 = vmatpush.bf16.msra.mxu0 %v764_v4  ;;  %v770_v13 = vld [vmem:[%s954_s1 + $0x60] sm:$0xff]  ;;  %v769_v17 = vld [vmem:[%s954_s1 + $0x58] sm:$0xff]  ;;  %v768_v21 = vld [vmem:[%s954_s1 + $0x50] sm:$0xff] }
  0x11   : > { %439 = vmatpush.bf16.msra.mxu1 %v772_v5  ;;  %v778_v14 = vld [vmem:[%s954_s1 + $0xa0] sm:$0xff]  ;;  %v777_v18 = vld [vmem:[%s954_s1 + $0x98] sm:$0xff]  ;;  %v776_v22 = vld [vmem:[%s954_s1 + $0x90] sm:$0xff] }
  0x12   : > { %453 = vmatpush.bf16.msra.mxu2 %v780_v6  ;;  %v786_v15 = vld [vmem:[%s954_s1 + $0xe0] sm:$0xff]  ;;  %v785_v19 = vld [vmem:[%s954_s1 + $0xd8] sm:$0xff]  ;;  %v784_v23 = vld [vmem:[%s954_s1 + $0xd0] sm:$0xff]  ;;  %v800_v53 = vpop.eup %799 }
  0x13   : > { %467 = vmatpush.bf16.msra.mxu3 %v788_v7  ;;  %v759_v24 = vld [vmem:[%s954_s1 + $0x8] sm:$0xff]  ;;  %v758_v28 = vld [vmem:[%s954_s1] sm:$0xff]  ;;  %v756_v33 = vld [vmem:[%s138_s14 + $0xc] sm:$0x10]  ;;  %v492_v58 = vmul.f32 9.0, %v800_v53  ;;  %vm496_vm2 = vweird.f32 %v800_v53 }
  0x14   : > { %426 = vmatpush.bf16.msra.mxu0 %v763_v8  ;;  %v767_v25 = vld [vmem:[%s954_s1 + $0x48] sm:$0xff]  ;;  %v766_v29 = vld [vmem:[%s954_s1 + $0x40] sm:$0xff]  ;;  %v610_v35 = vld [vmem:[%s138_s14 + $0x10] sm:$0x10] }
  0x15   : > { %440 = vmatpush.bf16.msra.mxu1 %v771_v9  ;;  %v775_v26 = vld [vmem:[%s954_s1 + $0x88] sm:$0xff]  ;;  %v774_v30 = vld [vmem:[%s954_s1 + $0x80] sm:$0xff]  ;;  %v757_v37 = vld [vmem:[%s138_s14 + $0x14] sm:$0x10]  ;;  %v493_v63 = vsub.f32 1.0, %v492_v58 }
  0x16   : > { %454 = vmatpush.bf16.msra.mxu2 %v779_v10  ;;  %v783_v27 = vld [vmem:[%s954_s1 + $0xc8] sm:$0xff]  ;;  %v782_v31 = vld [vmem:[%s954_s1 + $0xc0] sm:$0xff]  ;;  %v618_v39 = vld [vmem:[%s138_s14 + $0x18] sm:$0x10] }
  0x17   : > { %468 = vmatpush.bf16.msra.mxu3 %v787_v11  ;;  %v608_v32 = vld [vmem:[%s138_s14] sm:$0xf]  ;;  %v754_v34 = vld [vmem:[%s138_s14 + $0x4] sm:$0xf]  ;;  %v616_v36 = vld [vmem:[%s138_s14 + $0x8] sm:$0xf]  ;;  %v494_v2 = vmul.f32 %v800_v53, %v493_v63 }
  0x18   : > { %427 = vmatpush.bf16.msra.mxu0 %v762_v12  ;;  %v755_v38 = vld [vmem:[%s138_s14 + $0xc] sm:$0xf]  ;;  %v609_v40 = vor.u32 %v756_v33, %v608_v32  ;;  %v613_v41 = vor.u32 %v754_v34, %v610_v35  ;;  %v617_v42 = vor.u32 %v757_v37, %v616_v36  ;;  %vm538_vm10 = vmand %vm482_vm1, %vm537_vm6 }
  0x19   : > { %441 = vmatpush.bf16.msra.mxu1 %v770_v13  ;;  %v621_v43 = vor.u32 %v755_v38, %v618_v39  ;;  %v495_v5 = vadd.f32 %v800_v53, %v494_v2  ;;  %v539_v39 = vld [vmem:[%s143_s30 + $0x4] sm:$0x1] }
  0x1a   : > { %455 = vmatpush.bf16.msra.mxu2 %v778_v14 }
  0x1b   : > { %469 = vmatpush.bf16.msra.mxu3 %v786_v15  ;;  %v497_v8 = vsel %vm496_vm2, %v800_v53, %v495_v5 }
  0x1c   : > { %428 = vmatpush.bf16.msra.mxu0 %v761_v16 }
  0x1d   : > { %442 = vmatpush.bf16.msra.mxu1 %v769_v17 }
  0x1e   : > { %456 = vmatpush.bf16.msra.mxu2 %v777_v18 }
  0x1f   : > { %470 = vmatpush.bf16.msra.mxu3 %v785_v19 }
  0x20   : > { %429 = vmatpush.bf16.msra.mxu0 %v760_v20 }
  0x21   : > { %443 = vmatpush.bf16.msra.mxu1 %v768_v21 }
  0x22   : > { %457 = vmatpush.bf16.msra.mxu2 %v776_v22 }
  0x23   : > { %471 = vmatpush.bf16.msra.mxu3 %v784_v23 }
  0x24   : > { %430 = vmatpush.bf16.msra.mxu0 %v759_v24 }
  0x25   : > { %444 = vmatpush.bf16.msra.mxu1 %v767_v25 }
  0x26   : > { %458 = vmatpush.bf16.msra.mxu2 %v775_v26 }
  0x27   : > { %472 = vmatpush.bf16.msra.mxu3 %v783_v27 }
  0x28   : > { %431 = vmatpush.bf16.msra.mxu0 %v758_v28 }
  0x29   : > { %445 = vmatpush.bf16.msra.mxu1 %v766_v29 }
  0x2a   : > { %459 = vmatpush.bf16.msra.mxu2 %v774_v30 }
  0x2b   : > { %473 = vmatpush.bf16.msra.mxu3 %v782_v31  ;;  %432 = vmatmul.bf16.vlgmr.msra.gmra.mxu0 %v609_v40 }
  0x2c   : > { %446 = vmatmul.bf16.vlgmr.msra.gmra.mxu1 %v613_v41 }
  0x2d   : > { %460 = vmatmul.bf16.vlgmr.msra.gmra.mxu2 %v617_v42 }
  0x2e   : > { %474 = vmatmul.bf16.vlgmr.msra.gmra.mxu3 %v621_v43 }
  0xa8   : > { %v433_v44 = vpop.f32.mrf.mxu0 }
  0xa9   : > { %v447_v45 = vpop.f32.mrf.mxu1 }
  0xaa   : > { %v448_v49 = vadd.f32 %v447_v45, %v433_v44 }
  0xb0   : > { %v461_v46 = vpop.f32.mrf.mxu2  ;;  %v435_v50 = vpop.f32.mrf.mxu0 }
  0xb1   : > { %v475_v47 = vpop.f32.mrf.mxu3  ;;  %v449_v51 = vpop.f32.mrf.mxu1  ;;  %v462_v52 = vadd.f32 %v461_v46, %v448_v49 }
  0xb2   : > { %v450_v54 = vadd.f32 %v449_v51, %v435_v50 }
  0xb3   : > { %v476_v56 = vadd.f32 %v475_v47, %v462_v52 }
  0xb5   : > { %v481_v61 = vsel %vm480_vm0, %v476_v56, 0.0 }
  0xb8   : > { %v463_v55 = vpop.f32.mrf.mxu2 }
  0xb9   : > { %v464_v57 = vadd.f32 %v463_v55, %v450_v54  ;;  %v477_v59 = vpop.f32.mrf.mxu3 }
  0xbb   : > { %v478_v60 = vadd.f32 %v477_v59, %v464_v57 }
  0xbd   : > { %v483_v62 = vsel %vm482_vm1, %v478_v60, 0.0 }
  0xbe   : > { %v484_v0 = vadd.f32 %v483_v62, %v481_v61 }
  0xc0   : > { %v485_v1 = vrot.slane %v484_v0, 4 }
  0xc2   : > { %v486_v3 = vadd.f32 %v485_v1, %v484_v0 }
  0xc4   : > { %v487_v4 = vrot.slane %v486_v3, 2 }
  0xc6   : > { %v488_v6 = vadd.f32 %v487_v4, %v486_v3 }
  0xc8   : > { %v489_v7 = vrot.slane %v488_v6, 1 }
  0xca   : > { %v490_v9 = vadd.f32 %v489_v7, %v488_v6 }
  0xcc   : > { %v498_v10 = vmul.f32 %v497_v8, %v490_v9 }
  0xce   : > { %v499_v11 = vsub.f32 %v476_v56, %v498_v10  ;;  %v500_v12 = vsub.f32 %v478_v60, %v498_v10 }
  0xd0   : > { %v501_v13 = vmul.f32 %v499_v11, %v499_v11  ;;  %v502_v14 = vmul.f32 %v500_v12, %v500_v12 }
  0xd2   : > { %v503_v15 = vsel %vm480_vm0, %v501_v13, 0.0  ;;  %v504_v16 = vsel %vm482_vm1, %v502_v14, 0.0 }
  0xd3   : > { %v505_v17 = vadd.f32 %v504_v16, %v503_v15 }
  0xd5   : > { %v506_v18 = vrot.slane %v505_v17, 4 }
  0xd7   : > { %v507_v19 = vadd.f32 %v506_v18, %v505_v17 }
  0xd9   : > { %v508_v20 = vrot.slane %v507_v19, 2 }
  0xdb   : > { %v509_v21 = vadd.f32 %v508_v20, %v507_v19 }
  0xdd   : > { %v510_v22 = vrot.slane %v509_v21, 1 }
  0xdf   : > { %v511_v23 = vadd.f32 %v510_v22, %v509_v21 }
  0xe1   : > { %v512_v24 = vmul.f32 %v511_v23, %v497_v8 }
  0xe3   : > { %v513_v25 = vadd.f32 1e-05, %v512_v24 }
  0xe5   : > { %801 = vrsqrt.f32 %v513_v25  ;;  %vm520_vm4 = vweird.f32 %v513_v25 }
  0xeb   : > { %v802_v26 = vpop.eup %801 }
  0xec   : > { %v515_v27 = vmul.f32 %v802_v26, %v513_v25  ;;  %vm521_vm3 = vweird.f32 %v802_v26 }
  0xed   : > { %vm522_vm5 = vmor %vm520_vm4, %vm521_vm3 }
  0xee   : > { %v516_v28 = vmul.f32 %v802_v26, %v515_v27 }
  0xf0   : > { %v517_v29 = vmul.f32 0.5, %v516_v28 }
  0xf2   : > { %v518_v30 = vsub.f32 1.5, %v517_v29 }
  0xf4   : > { %v519_v31 = vmul.f32 %v802_v26, %v518_v30 }
  0xf6   : > { %v523_v32 = vsel %vm522_vm5, %v802_v26, %v519_v31 }
  0xf7   : > { %v524_v33 = vmul.f32 %v523_v32, %v499_v11  ;;  %v525_v34 = vmul.f32 %v523_v32, %v500_v12 }
  0xf9   : > { %vm526_vm7 = vcmp.ge.f32.partialorder %v524_v33, 0.0  ;;  %vm527_vm8 = vcmp.ge.f32.partialorder %v525_v34, 0.0  ;;  %v528_v35 = vmul.f32 0.2, %v524_v33  ;;  %v529_v36 = vmul.f32 0.2, %v525_v34 }
  0xfb   : > { %v530_v37 = vsel %vm526_vm7, %v524_v33, %v528_v35  ;;  %v531_v38 = vsel %vm527_vm8, %v525_v34, %v529_v36 }
  0xfc   : > { %v532_v40 = vpack.c.bf16 %v530_v37, %v530_v37  ;;  %v533_v41 = vpack.c.bf16 %v531_v38, %v531_v38 }
  0xfe   : > { %535 = vst.msk [vmem:[%s143_s30] sm:$0xf] %vm534_vm9, %v532_v40  ;;  %v540_v42 = vsel %vm538_vm10, %v533_v41, %v539_v39 }
  0xff   : > { %541 = vst [vmem:[%s143_s30 + $0x4] sm:$0x1] %v540_v42 }
 0x100 PF: > { %s12_s9 = sadd.s32 1, %s809_s9  }
 0x101   : > { %p9_p4 = scmp.ge.s32.totalorder %s12_s9, 4  }
 0x103   :  { %11 = sbr.rel (!%p9_p4) target bundleno = 1 (0x1), region = 58 }

// kernel: discriminator_forward.9
= control target key start
LH: loop header
LB: loop body
LE: loop exit
PB: predicated region body
PF: predicated region fallthrough
CT: control target
= control target key end

     0   :  { %vm668_vm0 = vcmask 7168   ;;  %s1225_s1 = inlined_call_operand.vmem [shape: bf16[1024,1], index: 1, kind: input, shape index: {}]   ;;  %s1226_s0 = inlined_call_operand.vmem [shape: bf16[8,1024], index: 0, kind: input, shape index: {}]   ;;  %s1227_s2 = inlined_call_operand.<no memory space> [shape: f32[1,1], index: 2, kind: input, shape index: {}]   ;;  %s1228_s3 = inlined_call_operand.vmem [shape: f32[8,1], index: 3, kind: output, shape index: {}]  }
   0x1   :  { %v937_v0 = vld [vmem:[%s1225_s1 + $0x38] sm:$0xff]  ;;  %v936_v4 = vld [vmem:[%s1225_s1 + $0x30] sm:$0xff]  ;;  %v935_v8 = vld [vmem:[%s1225_s1 + $0x28] sm:$0xff]  ;;  %v8_v48 = vstv %s1227_s2 }
   0x2   :  { %v945_v1 = vld [vmem:[%s1225_s1 + $0x78] sm:$0xff]  ;;  %564 = vmatpush.bf16.msra.mxu0 %v937_v0  ;;  %v944_v5 = vld [vmem:[%s1225_s1 + $0x70] sm:$0xff]  ;;  %v943_v9 = vld [vmem:[%s1225_s1 + $0x68] sm:$0xff]  ;;  %9 = vst [vmem:[#allocation2] sm:$0x1] %v8_v48 }
   0x3   :  { %v953_v2 = vld [vmem:[%s1225_s1 + $0xb8] sm:$0xff]  ;;  %577 = vmatpush.bf16.msra.mxu1 %v945_v1  ;;  %v952_v6 = vld [vmem:[%s1225_s1 + $0xb0] sm:$0xff]  ;;  %v951_v10 = vld [vmem:[%s1225_s1 + $0xa8] sm:$0xff] }
   0x4   :  { %v961_v3 = vld [vmem:[%s1225_s1 + $0xf8] sm:$0xff]  ;;  %590 = vmatpush.bf16.msra.mxu2 %v953_v2  ;;  %v960_v7 = vld [vmem:[%s1225_s1 + $0xf0] sm:$0xff]  ;;  %v959_v11 = vld [vmem:[%s1225_s1 + $0xe8] sm:$0xff] }
   0x5   :  { %603 = vmatpush.bf16.msra.mxu3 %v961_v3  ;;  %v934_v12 = vld [vmem:[%s1225_s1 + $0x20] sm:$0xff]  ;;  %v933_v16 = vld [vmem:[%s1225_s1 + $0x18] sm:$0xff]  ;;  %v932_v20 = vld [vmem:[%s1225_s1 + $0x10] sm:$0xff] }
   0x6   :  { %565 = vmatpush.bf16.msra.mxu0 %v936_v4  ;;  %v942_v13 = vld [vmem:[%s1225_s1 + $0x60] sm:$0xff]  ;;  %v941_v17 = vld [vmem:[%s1225_s1 + $0x58] sm:$0xff]  ;;  %v940_v21 = vld [vmem:[%s1225_s1 + $0x50] sm:$0xff] }
   0x7   :  { %578 = vmatpush.bf16.msra.mxu1 %v944_v5  ;;  %v950_v14 = vld [vmem:[%s1225_s1 + $0xa0] sm:$0xff]  ;;  %v949_v18 = vld [vmem:[%s1225_s1 + $0x98] sm:$0xff]  ;;  %v948_v22 = vld [vmem:[%s1225_s1 + $0x90] sm:$0xff] }
   0x8   :  { %591 = vmatpush.bf16.msra.mxu2 %v952_v6  ;;  %v958_v15 = vld [vmem:[%s1225_s1 + $0xe0] sm:$0xff]  ;;  %v957_v19 = vld [vmem:[%s1225_s1 + $0xd8] sm:$0xff]  ;;  %v956_v23 = vld [vmem:[%s1225_s1 + $0xd0] sm:$0xff] }
   0x9   :  { %604 = vmatpush.bf16.msra.mxu3 %v960_v7  ;;  %v931_v24 = vld [vmem:[%s1225_s1 + $0x8] sm:$0xff]  ;;  %v16_v29 = vld [vmem:[%s1226_s0] sm:$0xff]  ;;  %v969_v38 = vld [vmem:[%s1225_s1 + $0x138] sm:$0xff] }
   0xa   :  { %566 = vmatpush.bf16.msra.mxu0 %v935_v8  ;;  %v939_v25 = vld [vmem:[%s1225_s1 + $0x48] sm:$0xff]  ;;  %v930_v30 = vld [vmem:[%s1225_s1] sm:$0xff]  ;;  %v156_v36 = vunpack.c.l.b16 %v16_v29  ;;  %v157_v37 = vunpack.c.h.b16 %v16_v29  ;;  %v977_v39 = vld [vmem:[%s1225_s1 + $0x178] sm:$0xff] }
   0xb   :  { %579 = vmatpush.bf16.msra.mxu1 %v943_v9  ;;  %v947_v26 = vld [vmem:[%s1225_s1 + $0x88] sm:$0xff]  ;;  %v938_v31 = vld [vmem:[%s1225_s1 + $0x40] sm:$0xff]  ;;  %v985_v40 = vld [vmem:[%s1225_s1 + $0x1b8] sm:$0xff] }
   0xc   :  { %592 = vmatpush.bf16.msra.mxu2 %v951_v10  ;;  %v955_v27 = vld [vmem:[%s1225_s1 + $0xc8] sm:$0xff]  ;;  %v946_v34 = vld [vmem:[%s1225_s1 + $0x80] sm:$0xff]  ;;  %v993_v41 = vld [vmem:[%s1225_s1 + $0x1f8] sm:$0xff]  ;;  %v164_v44 = vpack.c.b16 %v156_v36, %v156_v36  ;;  %v165_v45 = vpack.c.b16 %v157_v37, %v157_v37 }
   0xd   :  { %605 = vmatpush.bf16.msra.mxu3 %v959_v11  ;;  %v17_v28 = vld [vmem:[%s1226_s0 + $0x8] sm:$0xff]  ;;  %v954_v35 = vld [vmem:[%s1225_s1 + $0xc0] sm:$0xff]  ;;  %v968_v46 = vld [vmem:[%s1225_s1 + $0x130] sm:$0xff] }
   0xe   :  { %567 = vmatpush.bf16.msra.mxu0 %v934_v12  ;;  %v158_v32 = vunpack.c.l.b16 %v17_v28  ;;  %v159_v33 = vunpack.c.h.b16 %v17_v28  ;;  %v976_v47 = vld [vmem:[%s1225_s1 + $0x170] sm:$0xff]  ;;  %v967_v51 = vld [vmem:[%s1225_s1 + $0x128] sm:$0xff]  ;;  %v966_v55 = vld [vmem:[%s1225_s1 + $0x120] sm:$0xff] }
   0xf   :  { %580 = vmatpush.bf16.msra.mxu1 %v942_v13  ;;  %v984_v49 = vld [vmem:[%s1225_s1 + $0x1b0] sm:$0xff]  ;;  %v975_v52 = vld [vmem:[%s1225_s1 + $0x168] sm:$0xff]  ;;  %v974_v56 = vld [vmem:[%s1225_s1 + $0x160] sm:$0xff] }
  0x10   :  { %593 = vmatpush.bf16.msra.mxu2 %v950_v14  ;;  %v166_v42 = vpack.c.b16 %v158_v32, %v158_v32  ;;  %v167_v43 = vpack.c.b16 %v159_v33, %v159_v33  ;;  %v992_v50 = vld [vmem:[%s1225_s1 + $0x1f0] sm:$0xff]  ;;  %v983_v53 = vld [vmem:[%s1225_s1 + $0x1a8] sm:$0xff]  ;;  %v982_v57 = vld [vmem:[%s1225_s1 + $0x1a0] sm:$0xff] }
  0x11   :  { %606 = vmatpush.bf16.msra.mxu3 %v958_v15  ;;  %v991_v54 = vld [vmem:[%s1225_s1 + $0x1e8] sm:$0xff]  ;;  %v990_v58 = vld [vmem:[%s1225_s1 + $0x1e0] sm:$0xff]  ;;  %v965_v59 = vld [vmem:[%s1225_s1 + $0x118] sm:$0xff] }
  0x12   :  { %568 = vmatpush.bf16.msra.mxu0 %v933_v16  ;;  %v973_v60 = vld [vmem:[%s1225_s1 + $0x158] sm:$0xff]  ;;  %v964_v63 = vld [vmem:[%s1225_s1 + $0x110] sm:$0xff]  ;;  %v963_v3 = vld [vmem:[%s1225_s1 + $0x108] sm:$0xff] }
  0x13   :  { %581 = vmatpush.bf16.msra.mxu1 %v941_v17  ;;  %v981_v61 = vld [vmem:[%s1225_s1 + $0x198] sm:$0xff]  ;;  %v972_v0 = vld [vmem:[%s1225_s1 + $0x150] sm:$0xff]  ;;  %v971_v4 = vld [vmem:[%s1225_s1 + $0x148] sm:$0xff] }
  0x14   :  { %594 = vmatpush.bf16.msra.mxu2 %v949_v18  ;;  %v989_v62 = vld [vmem:[%s1225_s1 + $0x1d8] sm:$0xff]  ;;  %v980_v1 = vld [vmem:[%s1225_s1 + $0x190] sm:$0xff]  ;;  %v979_v6 = vld [vmem:[%s1225_s1 + $0x188] sm:$0xff] }
  0x15   :  { %607 = vmatpush.bf16.msra.mxu3 %v957_v19  ;;  %v988_v2 = vld [vmem:[%s1225_s1 + $0x1d0] sm:$0xff]  ;;  %v987_v7 = vld [vmem:[%s1225_s1 + $0x1c8] sm:$0xff]  ;;  %v19_v8 = vld [vmem:[%s1226_s0 + $0x18] sm:$0xff] }
  0x16   :  { %569 = vmatpush.bf16.msra.mxu0 %v932_v20  ;;  %v18_v5 = vld [vmem:[%s1226_s0 + $0x10] sm:$0xff]  ;;  %v962_v11 = vld [vmem:[%s1225_s1 + $0x100] sm:$0xff]  ;;  %v162_v13 = vunpack.c.l.b16 %v19_v8  ;;  %v163_v14 = vunpack.c.h.b16 %v19_v8 }
  0x17   :  { %582 = vmatpush.bf16.msra.mxu1 %v940_v21  ;;  %v160_v9 = vunpack.c.l.b16 %v18_v5  ;;  %v161_v10 = vunpack.c.h.b16 %v18_v5  ;;  %v970_v12 = vld [vmem:[%s1225_s1 + $0x140] sm:$0xff] }
  0x18   :  { %595 = vmatpush.bf16.msra.mxu2 %v948_v22  ;;  %v978_v15 = vld [vmem:[%s1225_s1 + $0x180] sm:$0xff]  ;;  %v170_v19 = vpack.c.b16 %v162_v13, %v162_v13  ;;  %v171_v20 = vpack.c.b16 %v163_v14, %v163_v14 }
  0x19   :  { %608 = vmatpush.bf16.msra.mxu3 %v956_v23  ;;  %v986_v16 = vld [vmem:[%s1225_s1 + $0x1c0] sm:$0xff]  ;;  %v168_v17 = vpack.c.b16 %v160_v9, %v160_v9  ;;  %v169_v18 = vpack.c.b16 %v161_v10, %v161_v10 }
  0x1a   :  { %570 = vmatpush.bf16.msra.mxu0 %v931_v24 }
  0x1b   :  { %583 = vmatpush.bf16.msra.mxu1 %v939_v25 }
  0x1c   :  { %596 = vmatpush.bf16.msra.mxu2 %v947_v26 }
  0x1d   :  { %609 = vmatpush.bf16.msra.mxu3 %v955_v27  ;;  %v994_v27 = vld [vmem:[#allocation2] ss:$0 sm:$0xff] }
  0x1e   :  { %571 = vmatpush.bf16.msra.mxu0 %v930_v30 }
  0x1f   :  { %584 = vmatpush.bf16.msra.mxu1 %v938_v31 }
  0x20   :  { %597 = vmatpush.bf16.msra.mxu2 %v946_v34 }
  0x21   :  { %610 = vmatpush.bf16.msra.mxu3 %v954_v35  ;;  %572 = vmatmul.bf16.vlgmr.msra.gmra.mxu0 %v164_v44 }
  0x22   :  { %616 = vmatpush.bf16.msrb.mxu0 %v969_v38  ;;  %585 = vmatmul.bf16.vlgmr.msra.gmra.mxu1 %v165_v45 }
  0x23   :  { %629 = vmatpush.bf16.msrb.mxu1 %v977_v39  ;;  %598 = vmatmul.bf16.vlgmr.msra.gmra.mxu2 %v166_v42 }
  0x24   :  { %642 = vmatpush.bf16.msrb.mxu2 %v985_v40  ;;  %611 = vmatmul.bf16.vlgmr.msra.gmra.mxu3 %v167_v43 }
  0x25   :  { %655 = vmatpush.bf16.msrb.mxu3 %v993_v41 }
  0x26   :  { %617 = vmatpush.bf16.msrb.mxu0 %v968_v46 }
  0x27   :  { %630 = vmatpush.bf16.msrb.mxu1 %v976_v47 }
  0x28   :  { %643 = vmatpush.bf16.msrb.mxu2 %v984_v49 }
  0x29   :  { %656 = vmatpush.bf16.msrb.mxu3 %v992_v50 }
  0x2a   :  { %618 = vmatpush.bf16.msrb.mxu0 %v967_v51 }
  0x2b   :  { %631 = vmatpush.bf16.msrb.mxu1 %v975_v52 }
  0x2c   :  { %644 = vmatpush.bf16.msrb.mxu2 %v983_v53 }
  0x2d   :  { %657 = vmatpush.bf16.msrb.mxu3 %v991_v54 }
  0x2e   :  { %619 = vmatpush.bf16.msrb.mxu0 %v966_v55 }
  0x2f   :  { %632 = vmatpush.bf16.msrb.mxu1 %v974_v56 }
  0x30   :  { %645 = vmatpush.bf16.msrb.mxu2 %v982_v57 }
  0x31   :  { %658 = vmatpush.bf16.msrb.mxu3 %v990_v58 }
  0x32   :  { %620 = vmatpush.bf16.msrb.mxu0 %v965_v59 }
  0x33   :  { %633 = vmatpush.bf16.msrb.mxu1 %v973_v60 }
  0x34   :  { %646 = vmatpush.bf16.msrb.mxu2 %v981_v61 }
  0x35   :  { %659 = vmatpush.bf16.msrb.mxu3 %v989_v62 }
  0x36   :  { %621 = vmatpush.bf16.msrb.mxu0 %v964_v63 }
  0x37   :  { %634 = vmatpush.bf16.msrb.mxu1 %v972_v0 }
  0x38   :  { %647 = vmatpush.bf16.msrb.mxu2 %v980_v1 }
  0x39   :  { %660 = vmatpush.bf16.msrb.mxu3 %v988_v2 }
  0x3a   :  { %622 = vmatpush.bf16.msrb.mxu0 %v963_v3 }
  0x3b   :  { %635 = vmatpush.bf16.msrb.mxu1 %v971_v4 }
  0x3c   :  { %648 = vmatpush.bf16.msrb.mxu2 %v979_v6 }
  0x3d   :  { %661 = vmatpush.bf16.msrb.mxu3 %v987_v7 }
  0x3e   :  { %623 = vmatpush.bf16.msrb.mxu0 %v962_v11 }
  0x3f   :  { %636 = vmatpush.bf16.msrb.mxu1 %v970_v12 }
  0x40   :  { %649 = vmatpush.bf16.msrb.mxu2 %v978_v15 }
  0x41   :  { %662 = vmatpush.bf16.msrb.mxu3 %v986_v16  ;;  %624 = vmatmul.bf16.vlgmr.msrb.gmra.mxu0 %v168_v17 }
  0x42   :  { %637 = vmatmul.bf16.vlgmr.msrb.gmra.mxu1 %v169_v18 }
  0x43   :  { %650 = vmatmul.bf16.vlgmr.msrb.gmra.mxu2 %v170_v19 }
  0x44   :  { %663 = vmatmul.bf16.vlgmr.msrb.gmra.mxu3 %v171_v20 }
  0x9e   :  { %v573_v21 = vpop.f32.mrf.mxu0 }
  0x9f   :  { %v586_v22 = vpop.f32.mrf.mxu1  ;;  %v574_v30 = vadd.f32 %v994_v27, %v573_v21 }
  0xa1   :  { %v587_v31 = vadd.f32 %v586_v22, %v574_v30 }
  0xa6   :  { %v599_v23 = vpop.f32.mrf.mxu2  ;;  %v575_v25 = vpop.f32.mrf.mxu0 }
  0xa7   :  { %v612_v24 = vpop.f32.mrf.mxu3  ;;  %v588_v26 = vpop.f32.mrf.mxu1  ;;  %v600_v32 = vadd.f32 %v599_v23, %v587_v31 }
  0xa9   :  { %v613_v33 = vadd.f32 %v612_v24, %v600_v32 }
  0xae   :  { %v601_v28 = vpop.f32.mrf.mxu2 }
  0xaf   :  { %v614_v29 = vpop.f32.mrf.mxu3 }
  0xbe   :  { %v625_v34 = vpop.f32.mrf.mxu0 }
  0xbf   :  { %v638_v35 = vpop.f32.mrf.mxu1  ;;  %v626_v36 = vadd.f32 %v625_v34, %v613_v33 }
  0xc1   :  { %v639_v37 = vadd.f32 %v638_v35, %v626_v36 }
  0xc6   :  { %v651_v38 = vpop.f32.mrf.mxu2  ;;  %v627_v41 = vpop.f32.mrf.mxu0 }
  0xc7   :  { %v664_v39 = vpop.f32.mrf.mxu3  ;;  %v652_v40 = vadd.f32 %v651_v38, %v639_v37  ;;  %v640_v42 = vpop.f32.mrf.mxu1 }
  0xc9   :  { %v665_v43 = vadd.f32 %v664_v39, %v652_v40 }
  0xcb   :  { %669 = vst.msk [vmem:[%s1228_s3] sm:$0xff] %vm668_vm0, %v665_v43 }
  0xce   :  { %v653_v44 = vpop.f32.mrf.mxu2 }
  0xcf   :  { %v666_v45 = vpop.f32.mrf.mxu3 }

</bundles_post_ra>
